<compile_context>
chip_gen: v7x
topology: tpu7x:2x2x1
jax: 0.10.0
libtpu: 0.0.40
codegen_flags: <defaults>
</compile_context>

<pallas_src>
import functools
import math

import jax
import jax.numpy as jnp
from jax.experimental import pallas as pl
from jax.experimental.pallas import tpu as pltpu


# ----------------------------------------------------------------------------
# Fused Pallas kernel: both decoders, all latents, single invocation.
# Activations are [2H, L*N] (lane-dense).  Weights are PyTorch [out, in].
# ----------------------------------------------------------------------------
def _fused_decoder_kernel(pts_ref, lat_ref, wp_ref, wc_ref, w01_ref, b01_ref,
                          wo_ref, bo_ref, out_ref, *, n_blocks, hidden2):
    wp = wp_ref[...]                 # [2H, dim+1]  f32 (bias folded as last col)
    pts = pts_ref[...]               # [dim+1, NL]  f32 (ones row folded at the end)

    # fc_p as (dim+1) VPU broadcast multiply-adds (K=4 is too shallow for the MXU).
    net = wp[:, 0:1] * pts[0:1, :]
    for d in range(1, wp.shape[1]):
        net = net + wp[:, d:d + 1] * pts[d:d + 1, :]        # [2H, NL] f32

    # Conditioning for ALL blocks in one MXU dot (bias folded via ones row in lat).
    c_all = jnp.dot(wc_ref[...], lat_ref[...],
                    preferred_element_type=jnp.float32)      # [NB*2H, NL] f32

    # n_blocks x (conditioning add + ResnetBlockFC), statically unrolled.
    for i in range(n_blocks):
        net = net + c_all[i * hidden2:(i + 1) * hidden2, :]
        h = jnp.maximum(net, 0.0).astype(w01_ref.dtype)
        h = jnp.dot(w01_ref[2 * i], h,
                    preferred_element_type=jnp.float32) + b01_ref[2 * i]
        h = jnp.maximum(h, 0.0).astype(w01_ref.dtype)
        dx = jnp.dot(w01_ref[2 * i + 1], h,
                     preferred_element_type=jnp.float32) + b01_ref[2 * i + 1]
        net = net + dx

    # fused fc_out: rows 0..11 -> qual head, row 12 -> width head.
    h = jnp.maximum(net, 0.0).astype(wo_ref.dtype)
    out_ref[...] = jnp.dot(wo_ref[...], h,
                           preferred_element_type=jnp.float32) + bo_ref[...]


# ----------------------------------------------------------------------------
# Wrapper: layout plumbing (transpose / repeat / lane padding) + pallas_call.
# ----------------------------------------------------------------------------
def occnet_width_decoder(query_points, latent, query_pos_enc, fused_params):
    # latent = cat([latent, query_pos_enc], dim=-1)  -> [L, 2C]
    lat = jnp.concatenate([latent, query_pos_enc], axis=-1)[:, 0, :]
    pts = query_points[0].astype(jnp.float32)                     # [N, dim]
    L = lat.shape[0]
    N, dim = pts.shape
    NL = L * N
    NLpad = max(128, ((NL + 127) // 128) * 128)                   # lane-dense columns

    # Transposed, lane-dense slabs.  Column l*N+n carries point n and latent l,
    # which realizes query_points.repeat_interleave(L, 0) without materializing
    # it per grid step.  Ones rows fold the fc_p / fc_c biases into the matmuls.
    pts_t = jnp.tile(pts.T, (1, L))                               # [dim, L*N]
    pts_aug = jnp.concatenate([pts_t, jnp.ones((1, NL), jnp.float32)], axis=0)
    lat_t = jnp.repeat(lat.T, N, axis=1)                          # [2C, L*N]
    lat_aug = jnp.concatenate([lat_t, jnp.ones((1, NL), lat_t.dtype)], axis=0)
    if NLpad != NL:
        pts_aug = jnp.pad(pts_aug, ((0, 0), (0, NLpad - NL)))
        lat_aug = jnp.pad(lat_aug, ((0, 0), (0, NLpad - NL)))
    lat_aug = lat_aug.astype(jnp.bfloat16)                        # MXU operand

    fp = fused_params
    n_out = fp["wo"].shape[0]                                     # 13
    n_blocks = fp["w01"].shape[0] // 2
    hidden2 = fp["w01"].shape[1]

    vmem = pl.BlockSpec(memory_space=pltpu.MemorySpace.VMEM)
    kernel = functools.partial(_fused_decoder_kernel,
                               n_blocks=n_blocks, hidden2=hidden2)
    out_k = pl.pallas_call(
        kernel,
        out_shape=jax.ShapeDtypeStruct((n_out, NLpad), jnp.float32),
        in_specs=[vmem] * 8,
        out_specs=vmem,
    )(pts_aug, lat_aug, fp["wp"], fp["wc"], fp["w01"], fp["b01"],
      fp["wo"], fp["bo"])

    # [13, L*N] (lane-dense kernel output) -> [L, N, 13] module output.
    return jnp.transpose(out_k[:, :NL].reshape(n_out, L, N), (1, 2, 0))


# ----------------------------------------------------------------------------
# Build the fused / block-diagonal parameter slabs (done once, outside the kernel).
# Per-decoder params are in PyTorch layout: weights [out, in], biases [out].
# ----------------------------------------------------------------------------
def build_fused_params(pq, pw):
    H, dim = pq["wp"].shape
    H2 = 2 * H
    NB = pq["wc"].shape[0]
    c2 = pq["wc"].shape[2]
    ncq = pq["wo"].shape[0]
    ncw = pw["wo"].shape[0]

    # fc_p: [2H, dim+1] with bias as the last column (f32, VPU path).
    wp = jnp.concatenate(
        [jnp.concatenate([pq["wp"], pq["bp"][:, None]], axis=1),
         jnp.concatenate([pw["wp"], pw["bp"][:, None]], axis=1)], axis=0)

    # fc_c (all blocks): [NB*2H, 2C+1] with bias column (bf16 MXU operand).
    wc_q = jnp.concatenate([pq["wc"], pq["bc"][:, :, None]], axis=2)
    wc_w = jnp.concatenate([pw["wc"], pw["bc"][:, :, None]], axis=2)
    wc = jnp.concatenate([wc_q, wc_w], axis=1).reshape(NB * H2, c2 + 1)

    # ResnetBlockFC fc_0 / fc_1 as block-diagonal [2H, 2H], interleaved (2i, 2i+1).
    def blockdiag(a, b):                                          # [NB, H, H] each
        z = jnp.zeros_like(a)
        return jnp.concatenate(
            [jnp.concatenate([a, z], axis=2),
             jnp.concatenate([z, b], axis=2)], axis=1)            # [NB, 2H, 2H]

    w0 = blockdiag(pq["w0"], pw["w0"])
    w1 = blockdiag(pq["w1"], pw["w1"])
    w01 = jnp.stack([w0, w1], axis=1).reshape(2 * NB, H2, H2)
    b0 = jnp.concatenate([pq["b0"], pw["b0"]], axis=1)            # [NB, 2H]
    b1 = jnp.concatenate([pq["b1"], pw["b1"]], axis=1)
    b01 = jnp.stack([b0, b1], axis=1).reshape(2 * NB, H2)[:, :, None]

    # fc_out head: rows 0..11 read cols 0..H-1 (qual), row 12 reads cols H..2H-1.
    wo = jnp.zeros((ncq + ncw, H2), jnp.float32)
    wo = wo.at[:ncq, :H].set(pq["wo"]).at[ncq:, H:].set(pw["wo"])
    bo = jnp.concatenate([pq["bo"], pw["bo"]], axis=0)[:, None]   # [13, 1]

    return dict(
        wp=wp.astype(jnp.float32),
        wc=wc.astype(jnp.bfloat16),
        w01=w01.astype(jnp.bfloat16),
        b01=b01.astype(jnp.float32),
        wo=wo.astype(jnp.bfloat16),
        bo=bo.astype(jnp.float32),
    )


# ----------------------------------------------------------------------------
# Deterministic PyTorch-Linear-style init (weights stored [out, in]).
# ----------------------------------------------------------------------------
def _linear_init(key, fan_in, fan_out):
    bound = 1.0 / math.sqrt(fan_in)
    kw, kb = jax.random.split(key)
    w = jax.random.uniform(kw, (fan_out, fan_in), jnp.float32, -bound, bound)
    b = jax.random.uniform(kb, (fan_out,), jnp.float32, -bound, bound)
    return w, b


def init_decoder_params(key, dim, c2, hidden, n_blocks, ncls):
    k_p, k_blocks, k_out = jax.random.split(key, 3)
    wp, bp = _linear_init(k_p, dim, hidden)
    ks = jax.random.split(k_blocks, n_blocks * 3)
    wc, bc, w0, b0, w1, b1 = [], [], [], [], [], []
    for i in range(n_blocks):
        w, b = _linear_init(ks[3 * i + 0], c2, hidden); wc.append(w); bc.append(b)
        w, b = _linear_init(ks[3 * i + 1], hidden, hidden); w0.append(w); b0.append(b)
        w, b = _linear_init(ks[3 * i + 2], hidden, hidden); w1.append(w); b1.append(b)
    wo, bo = _linear_init(k_out, hidden, ncls)
    return dict(
        wp=wp, bp=bp,
        wc=jnp.stack(wc), bc=jnp.stack(bc),
        w0=jnp.stack(w0), b0=jnp.stack(b0),
        w1=jnp.stack(w1), b1=jnp.stack(b1),
        wo=wo, bo=bo,
    )


# ----------------------------------------------------------------------------
# Pure-JAX f32 reference (faithful to the PyTorch forward) for correctness.
# The kernel uses bf16 MXU operands, hence the modest tolerance below.
# ----------------------------------------------------------------------------
def _decoder_ref(pts, lat, p):
    n_blocks = p["wc"].shape[0]

    def one(lat_row):
        net = pts @ p["wp"].T + p["bp"]
        for i in range(n_blocks):
            net = net + (lat_row @ p["wc"][i].T + p["bc"][i])
            h = jnp.maximum(net, 0.0) @ p["w0"][i].T + p["b0"][i]
            dx = jnp.maximum(h, 0.0) @ p["w1"][i].T + p["b1"][i]
            net = net + dx
        return jnp.maximum(net, 0.0) @ p["wo"].T + p["bo"]

    return jax.vmap(one)(lat)


def occnet_width_decoder_ref(query_points, latent, query_pos_enc, pq, pw):
    lat = jnp.concatenate([latent, query_pos_enc], axis=-1)[:, 0, :]
    pts = query_points[0].astype(jnp.float32)
    return jnp.concatenate(
        [_decoder_ref(pts, lat, pq), _decoder_ref(pts, lat, pw)], axis=-1)


# ----------------------------------------------------------------------------
if __name__ == "__main__":
    L, N, dim, c_dim, hidden, n_blocks = 2, 128, 3, 4, 32, 5
    c2 = 2 * c_dim  # latent_product=False -> fc_c input dim is 2*c_dim

    key = jax.random.PRNGKey(0)
    k_pts, k_lat, k_pos, k_q, k_w = jax.random.split(key, 5)
    query_points = jax.random.uniform(k_pts, (1, N, dim), jnp.float32, -0.5, 0.5)
    latent = jax.random.normal(k_lat, (L, 1, c_dim), jnp.float32)
    query_pos_enc = jax.random.normal(k_pos, (L, 1, c_dim), jnp.float32)

    params_qual = init_decoder_params(k_q, dim, c2, hidden, n_blocks, ncls=12)
    params_width = init_decoder_params(k_w, dim, c2, hidden, n_blocks, ncls=1)
    fused = build_fused_params(params_qual, params_width)

    fwd = jax.jit(occnet_width_decoder)
    out = fwd(query_points, latent, query_pos_enc, fused)
    out = jax.block_until_ready(out)
    assert out.shape == (L, N, 13), out.shape

    ref = occnet_width_decoder_ref(query_points, latent, query_pos_enc,
                                   params_qual, params_width)
    max_err = float(jnp.max(jnp.abs(out - ref)))
    assert jnp.allclose(out, ref, atol=5e-2, rtol=5e-2), max_err

    print("KERNEL_OK")
</pallas_src>

<mosaic_0001>
module attributes {stable_mosaic.version = 11 : i64} {
  func.func @_fused_decoder_kernel(%arg0: memref<4x256xf32, #tpu.memory_space<vmem>>, %arg1: memref<9x256xbf16, #tpu.memory_space<vmem>>, %arg2: memref<64x4xf32, #tpu.memory_space<vmem>>, %arg3: memref<320x9xbf16, #tpu.memory_space<vmem>>, %arg4: memref<10x64x64xbf16, #tpu.memory_space<vmem>>, %arg5: memref<10x64x1xf32, #tpu.memory_space<vmem>>, %arg6: memref<13x64xbf16, #tpu.memory_space<vmem>>, %arg7: memref<13x1xf32, #tpu.memory_space<vmem>>, %arg8: memref<13x256xf32, #tpu.memory_space<vmem>>) attributes {dimension_semantics = [], scalar_prefetch = 0 : i64, scratch_operands = 0 : i64, tpu.core_type = #tpu.core_type<tc>} {
    %c0 = arith.constant 0 : index
    %c0_0 = arith.constant 0 : index
    %0 = vector.load %arg2[%c0, %c0_0] : memref<64x4xf32, #tpu.memory_space<vmem>>, vector<64x4xf32>
    %c0_1 = arith.constant 0 : index
    %c0_2 = arith.constant 0 : index
    %1 = vector.load %arg0[%c0_1, %c0_2] : memref<4x256xf32, #tpu.memory_space<vmem>>, vector<4x256xf32>
    %2 = vector.extract_strided_slice %0 {offsets = [0, 0], sizes = [64, 1], strides = [1, 1]} : vector<64x4xf32> to vector<64x1xf32>
    %3 = vector.extract_strided_slice %1 {offsets = [0, 0], sizes = [1, 256], strides = [1, 1]} : vector<4x256xf32> to vector<1x256xf32>
    %4 = vector.broadcast %2 : vector<64x1xf32> to vector<64x256xf32>
    %5 = vector.broadcast %3 : vector<1x256xf32> to vector<64x256xf32>
    %6 = arith.mulf %4, %5 : vector<64x256xf32>
    %7 = vector.extract_strided_slice %0 {offsets = [0, 1], sizes = [64, 1], strides = [1, 1]} : vector<64x4xf32> to vector<64x1xf32>
    %8 = vector.extract_strided_slice %1 {offsets = [1, 0], sizes = [1, 256], strides = [1, 1]} : vector<4x256xf32> to vector<1x256xf32>
    %9 = vector.broadcast %7 : vector<64x1xf32> to vector<64x256xf32>
    %10 = vector.broadcast %8 : vector<1x256xf32> to vector<64x256xf32>
    %11 = arith.mulf %9, %10 : vector<64x256xf32>
    %12 = arith.addf %6, %11 : vector<64x256xf32>
    %13 = vector.extract_strided_slice %0 {offsets = [0, 2], sizes = [64, 1], strides = [1, 1]} : vector<64x4xf32> to vector<64x1xf32>
    %14 = vector.extract_strided_slice %1 {offsets = [2, 0], sizes = [1, 256], strides = [1, 1]} : vector<4x256xf32> to vector<1x256xf32>
    %15 = vector.broadcast %13 : vector<64x1xf32> to vector<64x256xf32>
    %16 = vector.broadcast %14 : vector<1x256xf32> to vector<64x256xf32>
    %17 = arith.mulf %15, %16 : vector<64x256xf32>
    %18 = arith.addf %12, %17 : vector<64x256xf32>
    %19 = vector.extract_strided_slice %0 {offsets = [0, 3], sizes = [64, 1], strides = [1, 1]} : vector<64x4xf32> to vector<64x1xf32>
    %20 = vector.extract_strided_slice %1 {offsets = [3, 0], sizes = [1, 256], strides = [1, 1]} : vector<4x256xf32> to vector<1x256xf32>
    %21 = vector.broadcast %19 : vector<64x1xf32> to vector<64x256xf32>
    %22 = vector.broadcast %20 : vector<1x256xf32> to vector<64x256xf32>
    %23 = arith.mulf %21, %22 : vector<64x256xf32>
    %24 = arith.addf %18, %23 : vector<64x256xf32>
    %c0_3 = arith.constant 0 : index
    %c0_4 = arith.constant 0 : index
    %25 = vector.load %arg3[%c0_3, %c0_4] : memref<320x9xbf16, #tpu.memory_space<vmem>>, vector<320x9xbf16>
    %c0_5 = arith.constant 0 : index
    %c0_6 = arith.constant 0 : index
    %26 = vector.load %arg1[%c0_5, %c0_6] : memref<9x256xbf16, #tpu.memory_space<vmem>>, vector<9x256xbf16>
    %cst = arith.constant dense<0.000000e+00> : vector<320x256xf32>
    %27 = tpu.matmul %25, %26, %cst {dimension_numbers = #tpu.dot_dimension_numbers<[1], [0], [0], [1], [0, 0, 1, 1], [], []>} : vector<320x9xbf16>, vector<9x256xbf16>, vector<320x256xf32> -> vector<320x256xf32>
    %28 = vector.extract_strided_slice %27 {offsets = [0, 0], sizes = [64, 256], strides = [1, 1]} : vector<320x256xf32> to vector<64x256xf32>
    %29 = arith.addf %24, %28 : vector<64x256xf32>
    %cst_7 = arith.constant 0.000000e+00 : f32
    %30 = vector.broadcast %cst_7 : f32 to vector<64x256xf32>
    %31 = arith.maximumf %29, %30 : vector<64x256xf32>
    %32 = arith.truncf %31 : vector<64x256xf32> to vector<64x256xbf16>
    %c0_8 = arith.constant 0 : index
    %c0_9 = arith.constant 0 : index
    %c0_10 = arith.constant 0 : index
    %33 = vector.load %arg4[%c0_8, %c0_9, %c0_10] : memref<10x64x64xbf16, #tpu.memory_space<vmem>>, vector<1x64x64xbf16>
    %34 = vector.shape_cast %33 : vector<1x64x64xbf16> to vector<64x64xbf16>
    %cst_11 = arith.constant dense<0.000000e+00> : vector<64x256xf32>
    %35 = tpu.matmul %34, %32, %cst_11 {dimension_numbers = #tpu.dot_dimension_numbers<[1], [0], [0], [1], [0, 0, 1, 1], [], []>} : vector<64x64xbf16>, vector<64x256xbf16>, vector<64x256xf32> -> vector<64x256xf32>
    %c0_12 = arith.constant 0 : index
    %c0_13 = arith.constant 0 : index
    %c0_14 = arith.constant 0 : index
    %36 = vector.load %arg5[%c0_12, %c0_13, %c0_14] : memref<10x64x1xf32, #tpu.memory_space<vmem>>, vector<1x64x1xf32>
    %37 = vector.shape_cast %36 : vector<1x64x1xf32> to vector<64x1xf32>
    %38 = vector.broadcast %37 : vector<64x1xf32> to vector<64x256xf32>
    %39 = arith.addf %35, %38 : vector<64x256xf32>
    %cst_15 = arith.constant 0.000000e+00 : f32
    %40 = vector.broadcast %cst_15 : f32 to vector<64x256xf32>
    %41 = arith.maximumf %39, %40 : vector<64x256xf32>
    %42 = arith.truncf %41 : vector<64x256xf32> to vector<64x256xbf16>
    %c1 = arith.constant 1 : index
    %c0_16 = arith.constant 0 : index
    %c0_17 = arith.constant 0 : index
    %43 = vector.load %arg4[%c1, %c0_16, %c0_17] : memref<10x64x64xbf16, #tpu.memory_space<vmem>>, vector<1x64x64xbf16>
    %44 = vector.shape_cast %43 : vector<1x64x64xbf16> to vector<64x64xbf16>
    %cst_18 = arith.constant dense<0.000000e+00> : vector<64x256xf32>
    %45 = tpu.matmul %44, %42, %cst_18 {dimension_numbers = #tpu.dot_dimension_numbers<[1], [0], [0], [1], [0, 0, 1, 1], [], []>} : vector<64x64xbf16>, vector<64x256xbf16>, vector<64x256xf32> -> vector<64x256xf32>
    %c1_19 = arith.constant 1 : index
    %c0_20 = arith.constant 0 : index
    %c0_21 = arith.constant 0 : index
    %46 = vector.load %arg5[%c1_19, %c0_20, %c0_21] : memref<10x64x1xf32, #tpu.memory_space<vmem>>, vector<1x64x1xf32>
    %47 = vector.shape_cast %46 : vector<1x64x1xf32> to vector<64x1xf32>
    %48 = vector.broadcast %47 : vector<64x1xf32> to vector<64x256xf32>
    %49 = arith.addf %45, %48 : vector<64x256xf32>
    %50 = arith.addf %29, %49 : vector<64x256xf32>
    %51 = vector.extract_strided_slice %27 {offsets = [64, 0], sizes = [64, 256], strides = [1, 1]} : vector<320x256xf32> to vector<64x256xf32>
    %52 = arith.addf %50, %51 : vector<64x256xf32>
    %cst_22 = arith.constant 0.000000e+00 : f32
    %53 = vector.broadcast %cst_22 : f32 to vector<64x256xf32>
    %54 = arith.maximumf %52, %53 : vector<64x256xf32>
    %55 = arith.truncf %54 : vector<64x256xf32> to vector<64x256xbf16>
    %c2 = arith.constant 2 : index
    %c0_23 = arith.constant 0 : index
    %c0_24 = arith.constant 0 : index
    %56 = vector.load %arg4[%c2, %c0_23, %c0_24] : memref<10x64x64xbf16, #tpu.memory_space<vmem>>, vector<1x64x64xbf16>
    %57 = vector.shape_cast %56 : vector<1x64x64xbf16> to vector<64x64xbf16>
    %cst_25 = arith.constant dense<0.000000e+00> : vector<64x256xf32>
    %58 = tpu.matmul %57, %55, %cst_25 {dimension_numbers = #tpu.dot_dimension_numbers<[1], [0], [0], [1], [0, 0, 1, 1], [], []>} : vector<64x64xbf16>, vector<64x256xbf16>, vector<64x256xf32> -> vector<64x256xf32>
    %c2_26 = arith.constant 2 : index
    %c0_27 = arith.constant 0 : index
    %c0_28 = arith.constant 0 : index
    %59 = vector.load %arg5[%c2_26, %c0_27, %c0_28] : memref<10x64x1xf32, #tpu.memory_space<vmem>>, vector<1x64x1xf32>
    %60 = vector.shape_cast %59 : vector<1x64x1xf32> to vector<64x1xf32>
    %61 = vector.broadcast %60 : vector<64x1xf32> to vector<64x256xf32>
    %62 = arith.addf %58, %61 : vector<64x256xf32>
    %cst_29 = arith.constant 0.000000e+00 : f32
    %63 = vector.broadcast %cst_29 : f32 to vector<64x256xf32>
    %64 = arith.maximumf %62, %63 : vector<64x256xf32>
    %65 = arith.truncf %64 : vector<64x256xf32> to vector<64x256xbf16>
    %c3 = arith.constant 3 : index
    %c0_30 = arith.constant 0 : index
    %c0_31 = arith.constant 0 : index
    %66 = vector.load %arg4[%c3, %c0_30, %c0_31] : memref<10x64x64xbf16, #tpu.memory_space<vmem>>, vector<1x64x64xbf16>
    %67 = vector.shape_cast %66 : vector<1x64x64xbf16> to vector<64x64xbf16>
    %cst_32 = arith.constant dense<0.000000e+00> : vector<64x256xf32>
    %68 = tpu.matmul %67, %65, %cst_32 {dimension_numbers = #tpu.dot_dimension_numbers<[1], [0], [0], [1], [0, 0, 1, 1], [], []>} : vector<64x64xbf16>, vector<64x256xbf16>, vector<64x256xf32> -> vector<64x256xf32>
    %c3_33 = arith.constant 3 : index
    %c0_34 = arith.constant 0 : index
    %c0_35 = arith.constant 0 : index
    %69 = vector.load %arg5[%c3_33, %c0_34, %c0_35] : memref<10x64x1xf32, #tpu.memory_space<vmem>>, vector<1x64x1xf32>
    %70 = vector.shape_cast %69 : vector<1x64x1xf32> to vector<64x1xf32>
    %71 = vector.broadcast %70 : vector<64x1xf32> to vector<64x256xf32>
    %72 = arith.addf %68, %71 : vector<64x256xf32>
    %73 = arith.addf %52, %72 : vector<64x256xf32>
    %74 = vector.extract_strided_slice %27 {offsets = [128, 0], sizes = [64, 256], strides = [1, 1]} : vector<320x256xf32> to vector<64x256xf32>
    %75 = arith.addf %73, %74 : vector<64x256xf32>
    %cst_36 = arith.constant 0.000000e+00 : f32
    %76 = vector.broadcast %cst_36 : f32 to vector<64x256xf32>
    %77 = arith.maximumf %75, %76 : vector<64x256xf32>
    %78 = arith.truncf %77 : vector<64x256xf32> to vector<64x256xbf16>
    %c4 = arith.constant 4 : index
    %c0_37 = arith.constant 0 : index
    %c0_38 = arith.constant 0 : index
    %79 = vector.load %arg4[%c4, %c0_37, %c0_38] : memref<10x64x64xbf16, #tpu.memory_space<vmem>>, vector<1x64x64xbf16>
    %80 = vector.shape_cast %79 : vector<1x64x64xbf16> to vector<64x64xbf16>
    %cst_39 = arith.constant dense<0.000000e+00> : vector<64x256xf32>
    %81 = tpu.matmul %80, %78, %cst_39 {dimension_numbers = #tpu.dot_dimension_numbers<[1], [0], [0], [1], [0, 0, 1, 1], [], []>} : vector<64x64xbf16>, vector<64x256xbf16>, vector<64x256xf32> -> vector<64x256xf32>
    %c4_40 = arith.constant 4 : index
    %c0_41 = arith.constant 0 : index
    %c0_42 = arith.constant 0 : index
    %82 = vector.load %arg5[%c4_40, %c0_41, %c0_42] : memref<10x64x1xf32, #tpu.memory_space<vmem>>, vector<1x64x1xf32>
    %83 = vector.shape_cast %82 : vector<1x64x1xf32> to vector<64x1xf32>
    %84 = vector.broadcast %83 : vector<64x1xf32> to vector<64x256xf32>
    %85 = arith.addf %81, %84 : vector<64x256xf32>
    %cst_43 = arith.constant 0.000000e+00 : f32
    %86 = vector.broadcast %cst_43 : f32 to vector<64x256xf32>
    %87 = arith.maximumf %85, %86 : vector<64x256xf32>
    %88 = arith.truncf %87 : vector<64x256xf32> to vector<64x256xbf16>
    %c5 = arith.constant 5 : index
    %c0_44 = arith.constant 0 : index
    %c0_45 = arith.constant 0 : index
    %89 = vector.load %arg4[%c5, %c0_44, %c0_45] : memref<10x64x64xbf16, #tpu.memory_space<vmem>>, vector<1x64x64xbf16>
    %90 = vector.shape_cast %89 : vector<1x64x64xbf16> to vector<64x64xbf16>
    %cst_46 = arith.constant dense<0.000000e+00> : vector<64x256xf32>
    %91 = tpu.matmul %90, %88, %cst_46 {dimension_numbers = #tpu.dot_dimension_numbers<[1], [0], [0], [1], [0, 0, 1, 1], [], []>} : vector<64x64xbf16>, vector<64x256xbf16>, vector<64x256xf32> -> vector<64x256xf32>
    %c5_47 = arith.constant 5 : index
    %c0_48 = arith.constant 0 : index
    %c0_49 = arith.constant 0 : index
    %92 = vector.load %arg5[%c5_47, %c0_48, %c0_49] : memref<10x64x1xf32, #tpu.memory_space<vmem>>, vector<1x64x1xf32>
    %93 = vector.shape_cast %92 : vector<1x64x1xf32> to vector<64x1xf32>
    %94 = vector.broadcast %93 : vector<64x1xf32> to vector<64x256xf32>
    %95 = arith.addf %91, %94 : vector<64x256xf32>
    %96 = arith.addf %75, %95 : vector<64x256xf32>
    %97 = vector.extract_strided_slice %27 {offsets = [192, 0], sizes = [64, 256], strides = [1, 1]} : vector<320x256xf32> to vector<64x256xf32>
    %98 = arith.addf %96, %97 : vector<64x256xf32>
    %cst_50 = arith.constant 0.000000e+00 : f32
    %99 = vector.broadcast %cst_50 : f32 to vector<64x256xf32>
    %100 = arith.maximumf %98, %99 : vector<64x256xf32>
    %101 = arith.truncf %100 : vector<64x256xf32> to vector<64x256xbf16>
    %c6 = arith.constant 6 : index
    %c0_51 = arith.constant 0 : index
    %c0_52 = arith.constant 0 : index
    %102 = vector.load %arg4[%c6, %c0_51, %c0_52] : memref<10x64x64xbf16, #tpu.memory_space<vmem>>, vector<1x64x64xbf16>
    %103 = vector.shape_cast %102 : vector<1x64x64xbf16> to vector<64x64xbf16>
    %cst_53 = arith.constant dense<0.000000e+00> : vector<64x256xf32>
    %104 = tpu.matmul %103, %101, %cst_53 {dimension_numbers = #tpu.dot_dimension_numbers<[1], [0], [0], [1], [0, 0, 1, 1], [], []>} : vector<64x64xbf16>, vector<64x256xbf16>, vector<64x256xf32> -> vector<64x256xf32>
    %c6_54 = arith.constant 6 : index
    %c0_55 = arith.constant 0 : index
    %c0_56 = arith.constant 0 : index
    %105 = vector.load %arg5[%c6_54, %c0_55, %c0_56] : memref<10x64x1xf32, #tpu.memory_space<vmem>>, vector<1x64x1xf32>
    %106 = vector.shape_cast %105 : vector<1x64x1xf32> to vector<64x1xf32>
    %107 = vector.broadcast %106 : vector<64x1xf32> to vector<64x256xf32>
    %108 = arith.addf %104, %107 : vector<64x256xf32>
    %cst_57 = arith.constant 0.000000e+00 : f32
    %109 = vector.broadcast %cst_57 : f32 to vector<64x256xf32>
    %110 = arith.maximumf %108, %109 : vector<64x256xf32>
    %111 = arith.truncf %110 : vector<64x256xf32> to vector<64x256xbf16>
    %c7 = arith.constant 7 : index
    %c0_58 = arith.constant 0 : index
    %c0_59 = arith.constant 0 : index
    %112 = vector.load %arg4[%c7, %c0_58, %c0_59] : memref<10x64x64xbf16, #tpu.memory_space<vmem>>, vector<1x64x64xbf16>
    %113 = vector.shape_cast %112 : vector<1x64x64xbf16> to vector<64x64xbf16>
    %cst_60 = arith.constant dense<0.000000e+00> : vector<64x256xf32>
    %114 = tpu.matmul %113, %111, %cst_60 {dimension_numbers = #tpu.dot_dimension_numbers<[1], [0], [0], [1], [0, 0, 1, 1], [], []>} : vector<64x64xbf16>, vector<64x256xbf16>, vector<64x256xf32> -> vector<64x256xf32>
    %c7_61 = arith.constant 7 : index
    %c0_62 = arith.constant 0 : index
    %c0_63 = arith.constant 0 : index
    %115 = vector.load %arg5[%c7_61, %c0_62, %c0_63] : memref<10x64x1xf32, #tpu.memory_space<vmem>>, vector<1x64x1xf32>
    %116 = vector.shape_cast %115 : vector<1x64x1xf32> to vector<64x1xf32>
    %117 = vector.broadcast %116 : vector<64x1xf32> to vector<64x256xf32>
    %118 = arith.addf %114, %117 : vector<64x256xf32>
    %119 = arith.addf %98, %118 : vector<64x256xf32>
    %120 = vector.extract_strided_slice %27 {offsets = [256, 0], sizes = [64, 256], strides = [1, 1]} : vector<320x256xf32> to vector<64x256xf32>
    %121 = arith.addf %119, %120 : vector<64x256xf32>
    %cst_64 = arith.constant 0.000000e+00 : f32
    %122 = vector.broadcast %cst_64 : f32 to vector<64x256xf32>
    %123 = arith.maximumf %121, %122 : vector<64x256xf32>
    %124 = arith.truncf %123 : vector<64x256xf32> to vector<64x256xbf16>
    %c8 = arith.constant 8 : index
    %c0_65 = arith.constant 0 : index
    %c0_66 = arith.constant 0 : index
    %125 = vector.load %arg4[%c8, %c0_65, %c0_66] : memref<10x64x64xbf16, #tpu.memory_space<vmem>>, vector<1x64x64xbf16>
    %126 = vector.shape_cast %125 : vector<1x64x64xbf16> to vector<64x64xbf16>
    %cst_67 = arith.constant dense<0.000000e+00> : vector<64x256xf32>
    %127 = tpu.matmul %126, %124, %cst_67 {dimension_numbers = #tpu.dot_dimension_numbers<[1], [0], [0], [1], [0, 0, 1, 1], [], []>} : vector<64x64xbf16>, vector<64x256xbf16>, vector<64x256xf32> -> vector<64x256xf32>
    %c8_68 = arith.constant 8 : index
    %c0_69 = arith.constant 0 : index
    %c0_70 = arith.constant 0 : index
    %128 = vector.load %arg5[%c8_68, %c0_69, %c0_70] : memref<10x64x1xf32, #tpu.memory_space<vmem>>, vector<1x64x1xf32>
    %129 = vector.shape_cast %128 : vector<1x64x1xf32> to vector<64x1xf32>
    %130 = vector.broadcast %129 : vector<64x1xf32> to vector<64x256xf32>
    %131 = arith.addf %127, %130 : vector<64x256xf32>
    %cst_71 = arith.constant 0.000000e+00 : f32
    %132 = vector.broadcast %cst_71 : f32 to vector<64x256xf32>
    %133 = arith.maximumf %131, %132 : vector<64x256xf32>
    %134 = arith.truncf %133 : vector<64x256xf32> to vector<64x256xbf16>
    %c9 = arith.constant 9 : index
    %c0_72 = arith.constant 0 : index
    %c0_73 = arith.constant 0 : index
    %135 = vector.load %arg4[%c9, %c0_72, %c0_73] : memref<10x64x64xbf16, #tpu.memory_space<vmem>>, vector<1x64x64xbf16>
    %136 = vector.shape_cast %135 : vector<1x64x64xbf16> to vector<64x64xbf16>
    %cst_74 = arith.constant dense<0.000000e+00> : vector<64x256xf32>
    %137 = tpu.matmul %136, %134, %cst_74 {dimension_numbers = #tpu.dot_dimension_numbers<[1], [0], [0], [1], [0, 0, 1, 1], [], []>} : vector<64x64xbf16>, vector<64x256xbf16>, vector<64x256xf32> -> vector<64x256xf32>
    %c9_75 = arith.constant 9 : index
    %c0_76 = arith.constant 0 : index
    %c0_77 = arith.constant 0 : index
    %138 = vector.load %arg5[%c9_75, %c0_76, %c0_77] : memref<10x64x1xf32, #tpu.memory_space<vmem>>, vector<1x64x1xf32>
    %139 = vector.shape_cast %138 : vector<1x64x1xf32> to vector<64x1xf32>
    %140 = vector.broadcast %139 : vector<64x1xf32> to vector<64x256xf32>
    %141 = arith.addf %137, %140 : vector<64x256xf32>
    %142 = arith.addf %121, %141 : vector<64x256xf32>
    %cst_78 = arith.constant 0.000000e+00 : f32
    %143 = vector.broadcast %cst_78 : f32 to vector<64x256xf32>
    %144 = arith.maximumf %142, %143 : vector<64x256xf32>
    %145 = arith.truncf %144 : vector<64x256xf32> to vector<64x256xbf16>
    %c0_79 = arith.constant 0 : index
    %c0_80 = arith.constant 0 : index
    %146 = vector.load %arg6[%c0_79, %c0_80] : memref<13x64xbf16, #tpu.memory_space<vmem>>, vector<13x64xbf16>
    %cst_81 = arith.constant dense<0.000000e+00> : vector<13x256xf32>
    %147 = tpu.matmul %146, %145, %cst_81 {dimension_numbers = #tpu.dot_dimension_numbers<[1], [0], [0], [1], [0, 0, 1, 1], [], []>} : vector<13x64xbf16>, vector<64x256xbf16>, vector<13x256xf32> -> vector<13x256xf32>
    %c0_82 = arith.constant 0 : index
    %c0_83 = arith.constant 0 : index
    %148 = vector.load %arg7[%c0_82, %c0_83] : memref<13x1xf32, #tpu.memory_space<vmem>>, vector<13x1xf32>
    %149 = vector.broadcast %148 : vector<13x1xf32> to vector<13x256xf32>
    %150 = arith.addf %147, %149 : vector<13x256xf32>
    %c0_84 = arith.constant 0 : index
    %c0_85 = arith.constant 0 : index
    %151 = vector.load %arg8[%c0_84, %c0_85] : memref<13x256xf32, #tpu.memory_space<vmem>>, vector<13x256xf32>
    tpu.vector_store %arg8[%c0_84, %c0_85], %150 {strides = array<i32>} : memref<13x256xf32, #tpu.memory_space<vmem>>, vector<13x256xf32>,
    return
  }
}

</mosaic_0001>

<bundles_post_ra>
// kernel: occnet_width_decoder.1
= control target key start
LH: loop header
LB: loop body
LE: loop exit
PB: predicated region body
PF: predicated region fallthrough
CT: control target
= control target key end

     0   :  { %vm571_vm0 = vcmask 1043456   ;;  %v3493_v0 = vmov 3   ;;  %v3494_v1 = vmov 1   ;;  %vm572_vm1 = vcmask 1044480   ;;  %s4967_s2 = inlined_call_operand.vmem [shape: f32[64,4], index: 2, kind: input, shape index: {}]   ;;  %s4968_s1 = inlined_call_operand.vmem [shape: bf16[9,256], index: 1, kind: input, shape index: {}]   ;;  %s4969_s3 = inlined_call_operand.vmem [shape: bf16[320,9], index: 3, kind: input, shape index: {}]   ;;  %s4970_s5 = inlined_call_operand.vmem [shape: f32[10,64,1], index: 5, kind: input, shape index: {}]   ;;  %s4971_s4 = inlined_call_operand.vmem [shape: bf16[10,64,64], index: 4, kind: input, shape index: {}]   ;;  %s4972_s0 = inlined_call_operand.vmem [shape: f32[4,256], index: 0, kind: input, shape index: {}]   ;;  %s4973_s7 = inlined_call_operand.vmem [shape: f32[13,1], index: 7, kind: input, shape index: {}]   ;;  %s4974_s6 = inlined_call_operand.vmem [shape: bf16[13,64], index: 6, kind: input, shape index: {}]   ;;  %s4975_s8 = inlined_call_operand.vmem [shape: f32[13,256], index: 8, kind: output, shape index: {}]  }
   0x1   :  { %3411 = vset.pattern.permute.xlu0 %v3493_v0  ;;  %3407 = vset.pattern.permute.xlu1 %v3494_v1  ;;  %v30_v2 = vld [vmem:[%s4967_s2] sm:$0xff]  ;;  %v33_v3 = vld [vmem:[%s4967_s2 + $0x18] sm:$0xff]  ;;  %v31_v4 = vld [vmem:[%s4967_s2 + $0x8] sm:$0xff]  ;;  %v3495_v6 = vmov 65535   ;;  %v4976_v9 = vmov 0   ;;  %vm510_vm2 = vcmask 72704  }
   0x2   :  { %279 = vperm.xlu0 %3411, %v30_v2   ;;  %115 = vperm.xlu1 %3407, %v30_v2   ;;  %v3429_v5 = vld [vmem:[%s4968_s1 + $0x4] ss:$8 sps:$4 sm:$0x1f]   ;;  %v573_v7 = vsel %vm571_vm0, 4294967295, %v3495_v6  ;;  %v3497_v14 = vmov 2   ;;  %v32_v15 = vld [vmem:[%s4967_s2 + $0x10] sm:$0xff] }
   0x3   :  { %v3431_v8 = vld [vmem:[%s4968_s1] ss:$8 sps:$4 sm:$0x1f]   ;;  %613 = vmatprep.mubr.bf16.mxu0 %v4976_v9  ;;  %763 = vmatprep.mubr.bf16.mxu1 %v4976_v9  ;;  %v574_v10 = vsel %vm572_vm1, %v573_v7, 0  ;;  %v3579_v17 = vld [vmem:[%s4967_s2 + $0x30] sm:$0xff]  ;;  %v37_v20 = vld [vmem:[%s4967_s2 + $0x38] sm:$0xff] }
   0x4   :  { %v579_v11 = vand.u32 %v3429_v5, %v574_v10  ;;  %v576_v12 = vand.u32 %v3431_v8, %v574_v10  ;;  %v3432_v13 = vld [vmem:[%s4969_s3] sm:$0xff]   ;;  %v3433_v16 = vld [vmem:[%s4969_s3 + $0x8] sm:$0xff]   ;;  %v3434_v18 = vld [vmem:[%s4969_s3 + $0x10] sm:$0xff]   ;;  %vm930_vm3 = vcmask 523264  }
   0x5   :  { %v34_v19 = vld [vmem:[%s4967_s2 + $0x20] sm:$0xff]  ;;  %v3435_v21 = vld [vmem:[%s4969_s3 + $0x18] sm:$0xff]   ;;  %v35_v22 = vld [vmem:[%s4967_s2 + $0x28] sm:$0xff] }
   0x6   :  { %291 = vperm.xlu0 %3411, %v33_v3   ;;  %119 = vperm.xlu1 %3407, %v31_v4   ;;  %v864_v23 = vld [vmem:[%s4970_s5 + $0x10] sm:$0xff]  ;;  %v867_v24 = vld [vmem:[%s4970_s5 + $0x28] sm:$0xff]  ;;  %v869_v25 = vld [vmem:[%s4970_s5 + $0x38] sm:$0xff] }
   0x7   :  { %581 = vmatprep.subr.bf16.mxu0 %v579_v11  ;;  %3208 = vmatprep.subr.bf16.mxu1 %v579_v11  ;;  %v2999_v26 = vld [vmem:[%s4970_s5 + $0x48] sm:$0xff]  ;;  %v3001_v27 = vld [vmem:[%s4970_s5 + $0x58] sm:$0xff]  ;;  %v862_v31 = vld [vmem:[%s4970_s5] sm:$0xff] }
   0x8   :  { %582 = vmatpush1.bf16.msra.mxu0 %v576_v12  ;;  %3209 = vmatpush1.bf16.msra.mxu1 %v576_v12  ;;  %v3003_v28 = vld [vmem:[%s4970_s5 + $0x68] sm:$0xff]  ;;  %v3005_v29 = vld [vmem:[%s4970_s5 + $0x78] sm:$0xff]  ;;  %v3437_v32 = vld [vmem:[%s4969_s3 + $0x80] sm:$0xff]  }
   0x9   :  { %v3436_v30 = vld [vmem:[%s4969_s3 + $0x78] sm:$0xff]   ;;  %v863_v33 = vld [vmem:[%s4970_s5 + $0x8] sm:$0xff]  ;;  %v866_v37 = vld [vmem:[%s4970_s5 + $0x20] sm:$0xff] }
   0xa   :  { %3417 = vset.pattern.permute.xlu0 %v4976_v9  ;;  %3408 = vset.pattern.permute.xlu1 %v3497_v14  ;;  %v865_v34 = vld [vmem:[%s4970_s5 + $0x18] sm:$0xff]  ;;  %v3438_v35 = vld [vmem:[%s4969_s3 + $0x88] sm:$0xff]   ;;  %v868_v39 = vld [vmem:[%s4970_s5 + $0x30] sm:$0xff] }
   0xb   :  { %2962 = vmatmul.mubr.msk.bf16.vlgmr.msra.gmra.mrb[0].mxu0 %vm510_vm2, %v3432_v13  ;;  %41 = vperm.xlu0 %3417, %v30_v2   ;;  %v3023_v36 = vld [vmem:[%s4970_s5 + $0x88] sm:$0xff]  ;;  %v3025_v38 = vld [vmem:[%s4970_s5 + $0x98] sm:$0xff]  ;;  %v3439_v40 = vld [vmem:[%s4969_s3 + $0x90] sm:$0xff]  }
   0xc   :  { %201 = vperm.xlu1 %3408, %v31_v4   ;;  %623 = vmatprep.mubr.bf16.mxu0 %v4976_v9  ;;  %v3027_v41 = vld [vmem:[%s4970_s5 + $0xa8] sm:$0xff]  ;;  %v2998_v42 = vld [vmem:[%s4970_s5 + $0x40] sm:$0xff]  ;;  %v3029_v43 = vld [vmem:[%s4970_s5 + $0xb8] sm:$0xff] }
   0xd   :  { %2977 = vmatmul.mubr.msk.bf16.vlgmr.msra.gmra.mrb[0].mxu1 %vm510_vm2, %v3436_v30  ;;  %v3000_v44 = vld [vmem:[%s4970_s5 + $0x50] sm:$0xff]  ;;  %v3440_v45 = vld [vmem:[%s4969_s3 + $0x98] sm:$0xff]   ;;  %v3047_v46 = vld [vmem:[%s4970_s5 + $0xc8] sm:$0xff] }
   0xe   :  { %773 = vmatprep.mubr.bf16.mxu1 %v4976_v9  ;;  %v3002_v47 = vld [vmem:[%s4970_s5 + $0x60] sm:$0xff]  ;;  %v3049_v48 = vld [vmem:[%s4970_s5 + $0xd8] sm:$0xff]  ;;  %v3004_v49 = vld [vmem:[%s4970_s5 + $0x70] sm:$0xff] }
   0xf   :  { %46 = vperm.xlu0 %3417, %v31_v4   ;;  %v3022_v50 = vld [vmem:[%s4970_s5 + $0x80] sm:$0xff]  ;;  %v3051_v52 = vld [vmem:[%s4970_s5 + $0xe8] sm:$0xff]  ;;  %v3024_v53 = vld [vmem:[%s4970_s5 + $0x90] sm:$0xff] }
  0x10   :  { %3409 = vset.pattern.permute.xlu1 %v4976_v9  ;;  %v3053_v54 = vld [vmem:[%s4970_s5 + $0xf8] sm:$0xff]  ;;  %v3026_v56 = vld [vmem:[%s4970_s5 + $0xa0] sm:$0xff]  ;;  %v3071_v57 = vld [vmem:[%s4970_s5 + $0x108] sm:$0xff] }
  0x11   :  { %51 = vperm.xlu1 %3409, %v32_v15   ;;  %v3028_v58 = vld [vmem:[%s4970_s5 + $0xb0] sm:$0xff]  ;;  %v3073_v59 = vld [vmem:[%s4970_s5 + $0x118] sm:$0xff]  ;;  %v3046_v61 = vld [vmem:[%s4970_s5 + $0xc0] sm:$0xff] }
  0x12   :  { %v3075_v62 = vld [vmem:[%s4970_s5 + $0x128] sm:$0xff]  ;;  %v3097_v5 = vld [vmem:[%s4970_s5 + $0x158] sm:$0xff]  ;;  %v3052_v6 = vld [vmem:[%s4970_s5 + $0xf0] sm:$0xff] }
  0x13   :  { %2963 = vmatmul.mubr.msk.bf16.gmra.mrb[4].mxu0 %vm510_vm2, %v3433_v16  ;;  %56 = vperm.xlu0 %3417, %v33_v3   ;;  %v3099_v8 = vld [vmem:[%s4970_s5 + $0x168] sm:$0xff]  ;;  %v3070_v11 = vld [vmem:[%s4970_s5 + $0x100] sm:$0xff]  ;;  %v3101_v12 = vld [vmem:[%s4970_s5 + $0x178] sm:$0xff] }
  0x14   :  { %633 = vmatprep.mubr.bf16.mxu0 %v4976_v9 }
  0x15   :  { %3410 = vset.pattern.permute.xlu1 %v3494_v1  ;;  %2978 = vmatmul.mubr.msk.bf16.gmra.mrb[4].mxu1 %vm510_vm2, %v3437_v32  ;;  %v80_v32 = vlaneseq }
  0x16   :  { %123 = vperm.xlu1 %3410, %v32_v15   ;;  %783 = vmatprep.mubr.bf16.mxu1 %v4976_v9 }
  0x17   :  { %71 = vperm.xlu0 %3417, %v3579_v17  }
  0x1a   :  { %127 = vperm.xlu1 %3410, %v33_v3  }
  0x1b   :  { %2964 = vmatmul.mubr.msk.bf16.gmra.mrb[8].mxu0 %vm510_vm2, %v3434_v18  ;;  %3419 = vset.pattern.permute.xlu0 %v3494_v1 }
  0x1c   :  { %131 = vperm.xlu0 %3419, %v34_v19   ;;  %643 = vmatprep.mubr.bf16.mxu0 %v4976_v9 }
  0x1d   :  { %2979 = vmatmul.mubr.msk.bf16.gmra.mrb[8].mxu1 %vm510_vm2, %v3438_v35  ;;  %v3100_v35 = vld [vmem:[%s4970_s5 + $0x170] sm:$0xff] }
  0x1e   :  { %3412 = vset.pattern.permute.xlu1 %v3493_v0  ;;  %793 = vmatprep.mubr.bf16.mxu1 %v4976_v9 }
  0x1f   :  { %283 = vperm.xlu1 %3412, %v31_v4  }
  0x20   :  { %143 = vperm.xlu0 %3419, %v37_v20  }
  0x23   :  { %3413 = vset.pattern.permute.xlu1 %v3497_v14  ;;  %2965 = vmatmul.mubr.msk.bf16.gmra.mrb[12].mxu0 %vm510_vm2, %v3435_v21  ;;  %v3076_v21 = vld [vmem:[%s4970_s5 + $0x130] sm:$0xff] }
  0x24   :  { %205 = vperm.xlu1 %3413, %v32_v15   ;;  %3422 = vset.pattern.permute.xlu0 %v3497_v14 }
  0x25   :  { %197 = vperm.xlu0 %3422, %v30_v2   ;;  %653 = vmatprep.mubr.bf16.mxu0 %v4976_v9  ;;  %v3050_v2 = vld [vmem:[%s4970_s5 + $0xe0] sm:$0xff] }
  0x26   :  { %2980 = vmatmul.mubr.msk.bf16.gmra.mrb[12].mxu1 %vm510_vm2, %v3439_v40  ;;  %v3118_v40 = vld [vmem:[%s4970_s5 + $0x180] sm:$0xff] }
  0x27   :  { %803 = vmatprep.mubr.bf16.mxu1 %v4976_v9 }
  0x28   :  { %3414 = vset.pattern.permute.xlu1 %v4976_v9 }
  0x29   :  { %61 = vperm.xlu1 %3414, %v34_v19   ;;  %209 = vperm.xlu0 %3422, %v33_v3   ;;  %v3095_v3 = vld [vmem:[%s4970_s5 + $0x148] sm:$0xff] }
  0x2d   :  { %66 = vperm.xlu1 %3414, %v35_v22   ;;  %221 = vperm.xlu0 %3422, %v3579_v17  }
  0x2e   :  { %2981 = vmatmul.mubr.msk.bf16.gmra.mrb[16].mxu1 %vm510_vm2, %v3440_v45 }
  0x2f   :  { %975 = vmatprep.mubr.bf16.mxu1 %v4976_v9 }
  0x31   :  { %3415 = vset.pattern.permute.xlu1 %v3494_v1  ;;  %3426 = vset.pattern.permute.xlu0 %v3493_v0 }
  0x32   :  { %135 = vperm.xlu1 %3415, %v35_v22   ;;  %307 = vperm.xlu0 %3426, %v37_v20  }
  0x36   :  { %3416 = vset.pattern.permute.xlu1 %v3493_v0  ;;  %3428 = vset.pattern.permute.xlu0 %v4976_v9 }
  0x37   :  { %287 = vperm.xlu1 %3416, %v32_v15   ;;  %882 = vperm.xlu0 %3428, %v864_v23   ;;  %v3119_v15 = vld [vmem:[%s4970_s5 + $0x188] sm:$0xff] }
  0x38   :  { %v3123_v23 = vld [vmem:[%s4970_s5 + $0x1a8] sm:$0xff] }
  0x3b   :  { %3418 = vset.pattern.permute.xlu1 %v3497_v14  ;;  %897 = vperm.xlu0 %3428, %v867_v24   ;;  %v3094_v24 = vld [vmem:[%s4970_s5 + $0x140] sm:$0xff] }
  0x3c   :  { %213 = vperm.xlu1 %3418, %v34_v19  }
  0x3f   :  { %907 = vperm.xlu0 %3428, %v869_v25  }
  0x40   :  { %217 = vperm.xlu1 %3418, %v35_v22  }
  0x43   :  { %1065 = vperm.xlu0 %3428, %v2999_v26   ;;  %v3125_v26 = vld [vmem:[%s4970_s5 + $0x1b8] sm:$0xff] }
  0x44   :  { %3420 = vset.pattern.permute.xlu1 %v4976_v9 }
  0x45   :  { %76 = vperm.xlu1 %3420, %v37_v20  }
  0x47   :  { %1075 = vperm.xlu0 %3428, %v3001_v27  }
  0x49   :  { %3421 = vset.pattern.permute.xlu1 %v3494_v1  ;;  %v3077_v1 = vld [vmem:[%s4970_s5 + $0x138] sm:$0xff] }
  0x4a   :  { %139 = vperm.xlu1 %3421, %v3579_v17  }
  0x4b   :  { %1085 = vperm.xlu0 %3428, %v3003_v28   ;;  %v3096_v28 = vld [vmem:[%s4970_s5 + $0x150] sm:$0xff] }
  0x4e   :  { %3423 = vset.pattern.permute.xlu1 %v3493_v0 }
  0x4f   :  { %295 = vperm.xlu1 %3423, %v34_v19   ;;  %1095 = vperm.xlu0 %3428, %v3005_v29   ;;  %v3121_v19 = vld [vmem:[%s4970_s5 + $0x198] sm:$0xff]  ;;  %v3143_v29 = vld [vmem:[%s4970_s5 + $0x1c8] sm:$0xff] }
  0x53   :  { %299 = vperm.xlu1 %3423, %v35_v22   ;;  %1284 = vperm.xlu0 %3428, %v3023_v36   ;;  %v81_v36 = vshrl.u32 %v80_v32, 7 }
  0x55   :  { %v152_v45 = vsub.s32 5, %v81_v36 }
  0x57   :  { %3424 = vset.pattern.permute.xlu1 %v3497_v14  ;;  %1294 = vperm.xlu0 %3428, %v3025_v38   ;;  %v3072_v14 = vld [vmem:[%s4970_s5 + $0x110] sm:$0xff]  ;;  %v3147_v38 = vld [vmem:[%s4970_s5 + $0x1e8] sm:$0xff] }
  0x58   :  { %225 = vperm.xlu1 %3424, %v37_v20  }
  0x5b   :  { %1304 = vperm.xlu0 %3428, %v3027_v41   ;;  %v148_v41 = vsub.s32 1, %v81_v36 }
  0x5c   :  { %3425 = vset.pattern.permute.xlu1 %v3493_v0  ;;  %v3048_v0 = vld [vmem:[%s4970_s5 + $0xd0] sm:$0xff] }
  0x5d   :  { %303 = vperm.xlu1 %3425, %v3579_v17   ;;  %v3074_v17 = vld [vmem:[%s4970_s5 + $0x120] sm:$0xff] }
  0x5f   :  { %1314 = vperm.xlu0 %3428, %v3029_v43   ;;  %v3149_v43 = vld [vmem:[%s4970_s5 + $0x1f8] sm:$0xff] }
  0x61   :  { %3427 = vset.pattern.permute.xlu1 %v4976_v9 }
  0x62   :  { %872 = vperm.xlu1 %3427, %v862_v31   ;;  %v3098_v31 = vld [vmem:[%s4970_s5 + $0x160] sm:$0xff] }
  0x63   :  { %1471 = vperm.xlu0 %3428, %v3047_v46   ;;  %v86_v46 = vsub.s32 4, %v81_v36 }
  0x66   :  { %877 = vperm.xlu1 %3427, %v863_v33  }
  0x67   :  { %1481 = vperm.xlu0 %3428, %v3049_v48  }
  0x6a   :  { %887 = vperm.xlu1 %3427, %v865_v34   ;;  %v3145_v34 = vld [vmem:[%s4970_s5 + $0x1d8] sm:$0xff] }
  0x6b   :  { %1491 = vperm.xlu0 %3428, %v3051_v52  }
  0x6e   :  { %892 = vperm.xlu1 %3427, %v866_v37  }
  0x6f   :  { %1501 = vperm.xlu0 %3428, %v3053_v54   ;;  %v230_v54 = vsub.s32 2, %v81_v36 }
  0x72   :  { %902 = vperm.xlu1 %3427, %v868_v39  }
  0x73   :  { %1690 = vperm.xlu0 %3428, %v3071_v57   ;;  %v316_v57 = vsub.s32 7, %v81_v36 }
  0x76   :  { %1060 = vperm.xlu1 %3427, %v2998_v42   ;;  %v82_v42 = vsub.s32 0, %v81_v36 }
  0x77   :  { %1700 = vperm.xlu0 %3428, %v3073_v59  }
  0x7a   :  { %1070 = vperm.xlu1 %3427, %v3000_v44   ;;  %v38_v44 = vld [vmem:[%s4972_s0] sm:$0xff] }
  0x7b   :  { %1710 = vperm.xlu0 %3428, %v3075_v62   ;;  %v149_v52 = vrot.slane %v38_v44, %v148_v41  ;;  %v87_v59 = vrot.slane %v38_v44, %v86_v46  ;;  %v3122_v62 = vld [vmem:[%s4970_s5 + $0x1a0] sm:$0xff] }
  0x7e   :  { %1080 = vperm.xlu1 %3427, %v3002_v47  }
  0x7f   :  { %1720 = vperm.xlu0 %3428, %v3077_v1   ;;  %v3871_v1 = vrot.slane %v149_v52, %v148_v41 }
  0x81   :  { %v3717_v51 = vpop.permute.xlu1 %115  ;;  %v3777_v10 = vpop.permute.xlu0 %279 }
  0x82   :  { %1090 = vperm.xlu1 %3427, %v3004_v49   ;;  %v3120_v49 = vld [vmem:[%s4970_s5 + $0x190] sm:$0xff] }
  0x83   :  { %1877 = vperm.xlu0 %3428, %v3095_v3   ;;  %v231_v3 = vrot.slane %v38_v44, %v230_v54 }
  0x85   :  { %v3728_v55 = vpop.permute.xlu1 %119  ;;  %v3793_v16 = vpop.permute.xlu0 %291 }
  0x86   :  { %1279 = vperm.xlu1 %3427, %v3022_v50   ;;  %v312_v50 = vsub.s32 3, %v81_v36 }
  0x87   :  { %1887 = vperm.xlu0 %3428, %v3097_v5  }
  0x8a   :  { %1289 = vperm.xlu1 %3427, %v3024_v53   ;;  %v3803_v20 = vpop.permute.xlu0 %41  ;;  %v83_v53 = vrot.slane %v38_v44, %v82_v42 }
  0x8b   :  { %v3742_v60 = vpop.permute.xlu1 %201  ;;  %1897 = vperm.xlu0 %3428, %v3099_v8   ;;  %v3169_v8 = vld [vmem:[%s4970_s5 + $0x218] sm:$0xff] }
  0x8e   :  { %1299 = vperm.xlu1 %3427, %v3026_v56   ;;  %v3816_v25 = vpop.permute.xlu0 %46  ;;  %v3167_v56 = vld [vmem:[%s4970_s5 + $0x208] sm:$0xff] }
  0x8f   :  { %1907 = vperm.xlu0 %3428, %v3101_v12  }
  0x90   :  { %v3750_v63 = vpop.permute.xlu1 %51 }
  0x92   :  { %1309 = vperm.xlu1 %3427, %v3028_v58   ;;  %v3829_v30 = vpop.permute.xlu0 %56  ;;  %v153_v58 = vrot.slane %v38_v44, %v152_v45 }
  0x93   :  { %2096 = vperm.xlu0 %3428, %v3119_v15  }
  0x94   :  { %v3882_v12 = vrot.slane %v153_v58, %v148_v41  ;;  %v3142_v41 = vld [vmem:[%s4970_s5 + $0x1c0] sm:$0xff] }
  0x95   :  { %v3764_v4 = vpop.permute.xlu1 %123 }
  0x96   :  { %1466 = vperm.xlu1 %3427, %v3046_v61   ;;  %v3842_v37 = vpop.permute.xlu0 %71  ;;  %v234_v61 = vsub.s32 6, %v81_v36  ;;  %v169_v58 = vmul.f32 %v3882_v12, %v3764_v4 }
  0x97   :  { %2106 = vperm.xlu0 %3428, %v3121_v19  }
  0x98   :  { %v235_v15 = vrot.slane %v38_v44, %v234_v61 }
  0x99   :  { %v3772_v7 = vpop.permute.xlu1 %127 }
  0x9a   :  { %1476 = vperm.xlu1 %3427, %v3048_v0   ;;  %v313_v0 = vrot.slane %v38_v44, %v312_v50  ;;  %v3907_v32 = vrot.slane %v235_v15, %v230_v54 }
  0x9b   :  { %2116 = vperm.xlu0 %3428, %v3123_v23   ;;  %v3858_v47 = vpop.permute.xlu0 %131  ;;  %v3893_v23 = vrot.slane %v231_v3, %v230_v54  ;;  %v168_v54 = vmul.f32 %v3871_v1, %v3764_v4  ;;  %v3446_v4 = vld [vmem:[%s4969_s3 + $0x28] sm:$0xff]  }
  0x9c   :  { %v3889_v19 = vrot.slane %v313_v0, %v312_v50  ;;  %v171_v0 = vmul.f32 %v3882_v12, %v3772_v7 }
  0x9d   :  { %v248_v45 = vmul.f32 %v3893_v23, %v3742_v60 }
  0x9e   :  { %1486 = vperm.xlu1 %3427, %v3050_v2   ;;  %v3785_v13 = vpop.permute.xlu1 %283  ;;  %v3873_v2 = vrot.slane %v83_v53, %v82_v42 }
  0x9f   :  { %2126 = vperm.xlu0 %3428, %v3125_v26   ;;  %v3875_v5 = vpop.permute.xlu0 %143  ;;  %v3171_v26 = vld [vmem:[%s4970_s5 + $0x228] sm:$0xff] }
  0xa0   :  { %v102_v53 = vmul.f32 %v3873_v2, %v3750_v63 }
  0xa2   :  { %1496 = vperm.xlu1 %3427, %v3052_v6  }
  0xa3   :  { %v3798_v18 = vpop.permute.xlu1 %205  ;;  %2283 = vperm.xlu0 %3428, %v3143_v29  }
  0xa6   :  { %1685 = vperm.xlu1 %3427, %v3070_v11   ;;  %v317_v11 = vrot.slane %v38_v44, %v316_v57  ;;  %v98_v44 = vmul.f32 %v3873_v2, %v3803_v20  ;;  %v104_v57 = vmul.f32 %v3873_v2, %v3829_v30 }
  0xa7   :  { %2293 = vperm.xlu0 %3428, %v3145_v34  }
  0xa8   :  { %v3808_v22 = vpop.permute.xlu1 %61  ;;  %v3903_v29 = vrot.slane %v317_v11, %v312_v50  ;;  %v3976_v11 = vmul.f32 %v3873_v2, %v3842_v37 }
  0xaa   :  { %1695 = vperm.xlu1 %3427, %v3072_v14   ;;  %v3884_v14 = vrot.slane %v87_v59, %v82_v42  ;;  %v164_v42 = vmul.f32 %v3871_v1, %v3717_v51  ;;  %v170_v59 = vmul.f32 %v3871_v1, %v3772_v7 }
  0xab   :  { %2303 = vperm.xlu0 %3428, %v3147_v38   ;;  %v198_v38 = vpop.permute.xlu0 %197 }
  0xac   :  { %v3821_v27 = vpop.permute.xlu1 %66  ;;  %v101_v34 = vmul.f32 %v3884_v14, %v3816_v25  ;;  %v99_v36 = vmul.f32 %v3884_v14, %v3803_v20  ;;  %v247_v52 = vmul.f32 %v3907_v32, %v198_v38  ;;  %v180_v61 = vadd.f32 %v164_v42, %v98_v44  ;;  %v3193_v42 = vld [vmem:[%s4970_s5 + $0x258] sm:$0xff] }
  0xad   :  { %v173_v44 = vmul.f32 %v3882_v12, %v3858_v47 }
  0xae   :  { %1705 = vperm.xlu1 %3427, %v3074_v17   ;;  %v3124_v17 = vld [vmem:[%s4970_s5 + $0x1b0] sm:$0xff] }
  0xaf   :  { %2313 = vperm.xlu0 %3428, %v3149_v43   ;;  %v3930_v43 = vmul.f32 %v3889_v19, %v3793_v16  ;;  %v210_v15 = vpop.permute.xlu0 %209 }
  0xb1   :  { %v3834_v33 = vpop.permute.xlu1 %135 }
  0xb2   :  { %1715 = vperm.xlu1 %3427, %v3076_v21   ;;  %v166_v21 = vmul.f32 %v3871_v1, %v3728_v55 }
  0xb3   :  { %2502 = vperm.xlu0 %3428, %v3167_v56   ;;  %v246_v56 = vmul.f32 %v3893_v23, %v198_v38  ;;  %v172_v38 = vmul.f32 %v3871_v1, %v3858_v47  ;;  %v3148_v47 = vld [vmem:[%s4970_s5 + $0x1f0] sm:$0xff] }
  0xb6   :  { %1872 = vperm.xlu1 %3427, %v3094_v24   ;;  %v3847_v39 = vpop.permute.xlu1 %287  ;;  %v100_v24 = vmul.f32 %v3873_v2, %v3816_v25  ;;  %v329_v25 = vmul.f32 %v3903_v29, %v3777_v10 }
  0xb7   :  { %2512 = vperm.xlu0 %3428, %v3169_v8   ;;  %v3191_v8 = vld [vmem:[%s4970_s5 + $0x248] sm:$0xff] }
  0xb8   :  { %v182_v46 = vadd.f32 %v166_v21, %v100_v24  ;;  %v3982_v21 = vadd.f32 %v168_v54, %v102_v53  ;;  %v330_v24 = vmul.f32 %v3889_v19, %v3785_v13 }
  0xba   :  { %1882 = vperm.xlu1 %3427, %v3096_v28   ;;  %v3445_v28 = vld [vmem:[%s4969_s3 + $0x20] sm:$0xff]  }
  0xbb   :  { %v3860_v48 = vpop.permute.xlu1 %213  ;;  %2966 = vmatmul.mubr.msk.bf16.gmra.mrb[16].mxu0 %vm510_vm2, %v3445_v28  ;;  %2522 = vperm.xlu0 %3428, %v3171_v26   ;;  %v331_v26 = vmul.f32 %v3903_v29, %v3785_v13  ;;  %v262_v28 = vadd.f32 %v246_v56, %v180_v61  ;;  %v106_v13 = vmul.f32 %v3873_v2, %v3808_v22 }
  0xbc   :  { %663 = vmatprep.mubr.bf16.mxu0 %v4976_v9 }
  0xbe   :  { %1892 = vperm.xlu1 %3427, %v3098_v31   ;;  %v167_v31 = vmul.f32 %v3882_v12, %v3728_v55  ;;  %v328_v55 = vmul.f32 %v3889_v19, %v3777_v10  ;;  %v3173_v10 = vld [vmem:[%s4970_s5 + $0x238] sm:$0xff] }
  0xbf   :  { %v3877_v6 = vpop.permute.xlu1 %217  ;;  %2532 = vperm.xlu0 %3428, %v3173_v10  }
  0xc0   :  { %v183_v50 = vadd.f32 %v167_v31, %v101_v34  ;;  %v3146_v31 = vld [vmem:[%s4970_s5 + $0x1e0] sm:$0xff]  ;;  %v186_v34 = vadd.f32 %v170_v59, %v104_v57 }
  0xc2   :  { %1902 = vperm.xlu1 %3427, %v3100_v35   ;;  %v165_v35 = vmul.f32 %v3882_v12, %v3717_v51  ;;  %v3941_v51 = vmul.f32 %v3903_v29, %v3793_v16  ;;  %v3144_v16 = vld [vmem:[%s4970_s5 + $0x1d0] sm:$0xff] }
  0xc3   :  { %2967 = vmatmul.mubr.msk.bf16.gmra.mrb[20].mxu0 %vm510_vm2, %v3446_v4  ;;  %2689 = vperm.xlu0 %3428, %v3191_v8   ;;  %v333_v8 = vmul.f32 %v3903_v29, %v3847_v39  ;;  %v4039_v4 = vpop.permute.xlu0 %221 }
  0xc4   :  { %v181_v20 = vadd.f32 %v165_v35, %v99_v36  ;;  %v251_v35 = vmul.f32 %v3907_v32, %v3798_v18  ;;  %673 = vmatprep.mubr.bf16.mxu0 %v4976_v9 }
  0xc6   :  { %2091 = vperm.xlu1 %3427, %v3118_v40   ;;  %v3915_v40 = vpop.permute.xlu1 %76  ;;  %v263_v7 = vadd.f32 %v247_v52, %v181_v20  ;;  %v344_v20 = vadd.f32 %v328_v55, %v262_v28  ;;  %v3166_v28 = vld [vmem:[%s4970_s5 + $0x200] sm:$0xff] }
  0xc7   :  { %2699 = vperm.xlu0 %3428, %v3193_v42  }
  0xca   :  { %2101 = vperm.xlu1 %3427, %v3120_v49   ;;  %v249_v49 = vmul.f32 %v3907_v32, %v3742_v60  ;;  %v103_v60 = vmul.f32 %v3884_v14, %v3750_v63  ;;  %v3966_v3 = vpop.permute.xlu1 %139  ;;  %v264_v63 = vadd.f32 %v248_v45, %v182_v46  ;;  %v4007_v45 = vmul.f32 %v3871_v1, %v3875_v5 }
  0xcb   :  { %v253_v46 = vmul.f32 %v3907_v32, %v210_v15 }
  0xcc   :  { %v346_v54 = vadd.f32 %v330_v24, %v264_v63  ;;  %v332_v24 = vmul.f32 %v3889_v19, %v3847_v39 }
  0xce   :  { %2111 = vperm.xlu1 %3427, %v3122_v62   ;;  %v105_v62 = vmul.f32 %v3884_v14, %v3829_v30  ;;  %v3980_v30 = vmul.f32 %v3884_v14, %v3842_v37  ;;  %v185_v37 = vadd.f32 %v169_v58, %v103_v60  ;;  %v4014_v52 = vpop.permute.xlu1 %295  ;;  %v188_v58 = vadd.f32 %v172_v38, %v106_v13  ;;  %v3197_v13 = vld [vmem:[%s4970_s5 + $0x278] sm:$0xff] }
  0xd0   :  { %v187_v36 = vadd.f32 %v171_v0, %v105_v62  ;;  %v267_v57 = vadd.f32 %v251_v35, %v185_v37  ;;  %v3195_v0 = vld [vmem:[%s4970_s5 + $0x268] sm:$0xff]  ;;  %v4063_v35 = vmul.f32 %v3907_v32, %v4039_v4 }
  0xd1   :  { %2709 = vperm.xlu0 %3428, %v3195_v0   ;;  %v2870_v0 = vld [vmem:[%s4973_s7 + $0x8] sm:$0x1f] }
  0xd2   :  { %2121 = vperm.xlu1 %3427, %v3124_v17   ;;  %v265_v17 = vadd.f32 %v249_v49, %v183_v50  ;;  %v345_v49 = vadd.f32 %v329_v25, %v263_v7  ;;  %v4012_v50 = vmul.f32 %v3882_v12, %v3875_v5  ;;  %v107_v25 = vmul.f32 %v3884_v14, %v3808_v22 }
  0xd3   :  { %v108_v22 = vmul.f32 %v3873_v2, %v3821_v27  ;;  %v269_v63 = vadd.f32 %v253_v46, %v187_v36  ;;  %v300_v36 = vpop.permute.xlu1 %299  ;;  %v349_v42 = vadd.f32 %v333_v8, %v267_v57  ;;  %v336_v8 = vmul.f32 %v3889_v19, %v4014_v52 }
  0xd4   :  { %v347_v56 = vadd.f32 %v331_v26, %v265_v17  ;;  %v174_v17 = vmul.f32 %v3871_v1, %v3834_v33  ;;  %v189_v39 = vadd.f32 %v173_v44, %v107_v25 }
  0xd5   :  { %v351_v44 = vadd.f32 %v3941_v51, %v269_v63  ;;  %2719 = vperm.xlu0 %3428, %v3197_v13   ;;  %v256_v51 = vmul.f32 %v3893_v23, %v3877_v6 }
  0xd6   :  { %2278 = vperm.xlu1 %3427, %v3142_v41   ;;  %v252_v41 = vmul.f32 %v3893_v23, %v210_v15  ;;  %v109_v15 = vmul.f32 %v3884_v14, %v3821_v27  ;;  %v254_v27 = vmul.f32 %v3893_v23, %v3860_v48 }
  0xd8   :  { %v268_v55 = vadd.f32 %v252_v41, %v186_v34 }
  0xd9   :  { %2878 = vperm.xlu0 %3428, %v2870_v0  }
  0xda   :  { %2288 = vperm.xlu1 %3427, %v3144_v16   ;;  %v250_v16 = vmul.f32 %v3893_v23, %v3798_v18  ;;  %v3447_v18 = vld [vmem:[%s4969_s3 + $0x30] sm:$0xff]   ;;  %v350_v46 = vadd.f32 %v3930_v43, %v268_v55  ;;  %v270_v43 = vadd.f32 %v254_v27, %v188_v58  ;;  %v3448_v58 = vld [vmem:[%s4969_s3 + $0x38] sm:$0xff]   ;;  %v176_v27 = vmul.f32 %v3871_v1, %v3966_v3 }
  0xdb   :  { %2968 = vmatmul.mubr.msk.bf16.gmra.mrb[24].mxu0 %vm510_vm2, %v3447_v18  ;;  %v112_v18 = vmul.f32 %v3873_v2, %v3915_v40  ;;  %v3170_v2 = vld [vmem:[%s4970_s5 + $0x220] sm:$0xff]  ;;  %v3172_v1 = vld [vmem:[%s4970_s5 + $0x230] sm:$0xff] }
  0xdc   :  { %683 = vmatprep.mubr.bf16.mxu0 %v4976_v9 }
  0xde   :  { %v615_v10 = vpop.f32.mrb[0].mxu0  ;;  %2298 = vperm.xlu1 %3427, %v3146_v31   ;;  %v175_v31 = vmul.f32 %v3882_v12, %v3834_v33  ;;  %v266_v33 = vadd.f32 %v250_v16, %v3982_v21  ;;  %v3168_v21 = vld [vmem:[%s4970_s5 + $0x210] sm:$0xff] }
  0xdf   :  { %v617_v53 = vpop.f32.mrb[1].mxu0  ;;  %v4025_v59 = vadd.f32 %v615_v10, %v344_v20  ;;  %v255_v20 = vmul.f32 %v3907_v32, %v3860_v48  ;;  %v257_v48 = vmul.f32 %v3907_v32, %v3877_v6  ;;  %v113_v6 = vmul.f32 %v3884_v14, %v3915_v40 }
  0xe0   :  { %v4023_v60 = vadd.f32 %v617_v53, %v345_v49  ;;  %v619_v5 = vpop.f32.mrb[2].mxu0  ;;  %v190_v49 = vadd.f32 %v174_v17, %v108_v22  ;;  %v337_v22 = vmul.f32 %v3903_v29, %v4014_v52  ;;  %v177_v14 = vmul.f32 %v3882_v12, %v3966_v3 }
  0xe1   :  { %v4027_v61 = vadd.f32 %v619_v5, %v346_v54  ;;  %v621_v62 = vpop.f32.mrb[3].mxu0  ;;  %v830_v38 = vmax.f32 %v4025_v59, 0.0  ;;  %v348_v54 = vadd.f32 %v332_v24, %v266_v33  ;;  %v226_v5 = vpop.permute.xlu1 %225  ;;  %v271_v24 = vadd.f32 %v255_v20, %v189_v39 }
  0xe2   :  { %v4041_v7 = vadd.f32 %v621_v62, %v347_v56  ;;  %2308 = vperm.xlu1 %3427, %v3148_v47   ;;  %v831_v37 = vmax.f32 %v4023_v60, 0.0  ;;  %v191_v47 = vadd.f32 %v175_v31, %v109_v15  ;;  %v338_v15 = vmul.f32 %v3889_v19, %v300_v36 }
  0xe3   :  { %v832_v26 = vmax.f32 %v4027_v61, 0.0  ;;  %2969 = vmatmul.mubr.msk.bf16.gmra.mrb[28].mxu0 %vm510_vm2, %v3448_v58  ;;  %v339_v40 = vmul.f32 %v3903_v29, %v300_v36  ;;  %v195_v12 = vadd.f32 %v4012_v50, %v113_v6  ;;  %v353_v36 = vadd.f32 %v337_v22, %v271_v24 }
  0xe4   :  { %v833_v34 = vmax.f32 %v4041_v7, 0.0  ;;  %693 = vmatprep.mubr.bf16.mxu0 %v4976_v9  ;;  %v273_v31 = vadd.f32 %v257_v48, %v191_v47  ;;  %v260_v33 = vmul.f32 %v3893_v23, %v226_v5  ;;  %v193_v3 = vadd.f32 %v177_v14, %v3980_v30  ;;  %v3190_v48 = vld [vmem:[%s4970_s5 + $0x240] sm:$0xff] }
  0xe5   :  { %v846_v53 = vpack.c.bf16 %v832_v26, %v830_v38  ;;  %v304_v13 = vpop.permute.xlu1 %303  ;;  %v192_v20 = vadd.f32 %v176_v27, %v3976_v11 }
  0xe6   :  { %v625_v41 = vpop.f32.mrb[4].mxu0  ;;  %v847_v10 = vpack.c.bf16 %v833_v34, %v831_v37  ;;  %2497 = vperm.xlu1 %3427, %v3166_v28   ;;  %v272_v28 = vadd.f32 %v256_v51, %v190_v49  ;;  %v194_v34 = vadd.f32 %v4007_v45, %v112_v18  ;;  %v261_v45 = vmul.f32 %v3907_v32, %v226_v5  ;;  %v3449_v32 = vld [vmem:[%s4969_s3 + $0x40] sm:$0xff]  }
  0xe7   :  { %v627_v56 = vpop.f32.mrb[5].mxu0  ;;  %v4083_v57 = vadd.f32 %v625_v41, %v348_v54  ;;  %v355_v49 = vadd.f32 %v339_v40, %v273_v31  ;;  %v308_v54 = vpop.permute.xlu0 %307  ;;  %v275_v5 = vadd.f32 %v4063_v35, %v193_v3  ;;  %v3192_v35 = vld [vmem:[%s4970_s5 + $0x250] sm:$0xff]  ;;  %v3450_v31 = vld [vmem:[%s4969_s3 + $0x48] sm:$0xff]   ;;  %v3444_v3 = vld [vmem:[%s4971_s4 + $0x18] sm:$0xff]  }
  0xe8   :  { %v4077_v16 = vadd.f32 %v627_v56, %v349_v42  ;;  %v629_v25 = vpop.f32.mrb[6].mxu0  ;;  %943 = vmatprep.subr.bf16.mxu1 %v847_v10  ;;  %v352_v42 = vadd.f32 %v336_v8, %v270_v43  ;;  %v354_v10 = vadd.f32 %v338_v15, %v272_v28  ;;  %v342_v30 = vmul.f32 %v3889_v19, %v308_v54 }
  0xe9   :  { %v4085_v55 = vadd.f32 %v629_v25, %v350_v46  ;;  %v631_v62 = vpop.f32.mrb[7].mxu0  ;;  %944 = vmatpush1.bf16.msra.mxu1 %v846_v53  ;;  %v834_v37 = vmax.f32 %v4083_v57, 0.0  ;;  %v258_v53 = vmul.f32 %v3893_v23, %v4039_v4  ;;  %v341_v25 = vmul.f32 %v3903_v29, %v304_v13 }
  0xea   :  { %v4099_v63 = vadd.f32 %v631_v62, %v351_v44  ;;  %2507 = vperm.xlu1 %3427, %v3168_v21   ;;  %v835_v26 = vmax.f32 %v4077_v16, 0.0  ;;  %v343_v23 = vmul.f32 %v3903_v29, %v308_v54  ;;  %v276_v11 = vadd.f32 %v260_v33, %v194_v34  ;;  %v3194_v34 = vld [vmem:[%s4970_s5 + $0x260] sm:$0xff] }
  0xeb   :  { %v836_v17 = vmax.f32 %v4085_v55, 0.0  ;;  %v340_v4 = vmul.f32 %v3889_v19, %v304_v13  ;;  %2970 = vmatmul.mubr.msk.bf16.gmra.mrb[32].mxu0 %vm510_vm2, %v3449_v32  ;;  %v277_v62 = vadd.f32 %v261_v45, %v195_v12  ;;  %v274_v29 = vadd.f32 %v258_v53, %v192_v20  ;;  %v3196_v13 = vld [vmem:[%s4970_s5 + $0x270] sm:$0xff]  ;;  %v4208_v45 = vpop.f32.mrb[0].mxu1 }
  0xec   :  { %v837_v52 = vmax.f32 %v4099_v63, 0.0  ;;  %703 = vmatprep.mubr.bf16.mxu0 %v4976_v9  ;;  %v357_v6 = vadd.f32 %v341_v25, %v275_v5  ;;  %v358_v24 = vadd.f32 %v342_v30, %v276_v11  ;;  %5001 = vst [vmem:[#allocation3_spill] sm:$0xff] %v4208_v45 }
  0xed   :  { %v848_v41 = vpack.c.bf16 %v836_v17, %v834_v37  ;;  %v356_v15 = vadd.f32 %v340_v4, %v274_v29  ;;  %v359_v40 = vadd.f32 %v343_v23, %v277_v62 }
  0xee   :  { %v635_v39 = vpop.f32.mrb[8].mxu0  ;;  %v849_v38 = vpack.c.bf16 %v837_v52, %v835_v26  ;;  %2517 = vperm.xlu1 %3427, %v3170_v2  }
  0xef   :  { %v637_v46 = vpop.f32.mrb[9].mxu0  ;;  %v4131_v56 = vadd.f32 %v635_v39, %v352_v42  ;;  %v3451_v42 = vld [vmem:[%s4969_s3 + $0x50] sm:$0xff]  }
  0xf0   :  { %v4126_v50 = vadd.f32 %v637_v46, %v353_v36  ;;  %v639_v44 = vpop.f32.mrb[10].mxu0  ;;  %945 = vmatprep.subr.bf16.mxu1 %v849_v38  ;;  %v2869_v46 = vld [vmem:[%s4973_s7] sm:$0xff] }
  0xf1   :  { %v4133_v21 = vadd.f32 %v639_v44, %v354_v10  ;;  %v641_v47 = vpop.f32.mrb[11].mxu0  ;;  %946 = vmatpush1.bf16.msra.mxu1 %v848_v41  ;;  %v838_v19 = vmax.f32 %v4131_v56, 0.0  ;;  %v3441_v41 = vld [vmem:[%s4971_s4] sm:$0xff]   ;;  %v3442_v10 = vld [vmem:[%s4971_s4 + $0x8] sm:$0xff]   ;;  %v4210_v44 = vpop.f32.mrb[1].mxu1 }
  0xf2   :  { %v4140_v43 = vadd.f32 %v641_v47, %v355_v49  ;;  %2527 = vperm.xlu1 %3427, %v3172_v1   ;;  %v839_v0 = vmax.f32 %v4126_v50, 0.0  ;;  %v3443_v1 = vld [vmem:[%s4971_s4 + $0x10] sm:$0xff]   ;;  %5002 = vst [vmem:[#allocation4_spill] sm:$0xff] %v4210_v44  ;;  %v4212_v49 = vpop.f32.mrb[2].mxu1 }
  0xf3   :  { %v840_v51 = vmax.f32 %v4133_v21, 0.0  ;;  %2971 = vmatmul.mubr.msk.bf16.gmra.mrb[36].mxu0 %vm510_vm2, %v3450_v31  ;;  %5003 = vst [vmem:[#allocation5_spill] sm:$0xff] %v4212_v49  ;;  %v4214_v20 = vpop.f32.mrb[3].mxu1 }
  0xf4   :  { %v841_v58 = vmax.f32 %v4140_v43, 0.0  ;;  %713 = vmatprep.mubr.bf16.mxu0 %v4976_v9  ;;  %5004 = vst [vmem:[#allocation6_spill] sm:$0xff] %v4214_v20  ;;  %v4216_v53 = vpop.f32.mrb[4].mxu1 }
  0xf5   :  { %v850_v8 = vpack.c.bf16 %v840_v51, %v838_v19  ;;  %5005 = vst [vmem:[#allocation7_spill] sm:$0xff] %v4216_v53  ;;  %v4218_v54 = vpop.f32.mrb[5].mxu1  ;;  %v3452_v19 = vld [vmem:[%s4969_s3 + $0x58] sm:$0xff]  }
  0xf6   :  { %v645_v18 = vpop.f32.mrb[12].mxu0  ;;  %v851_v22 = vpack.c.bf16 %v841_v58, %v839_v0  ;;  %2684 = vperm.xlu1 %3427, %v3190_v48   ;;  %5006 = vst [vmem:[#allocation8_spill] sm:$0xff] %v4218_v54  ;;  %v4220_v47 = vpop.f32.mrb[6].mxu1 }
  0xf7   :  { %v647_v17 = vpop.f32.mrb[13].mxu0  ;;  %v4159_v26 = vadd.f32 %v645_v18, %v356_v15  ;;  %5007 = vst [vmem:[#allocation9_spill] sm:$0xff] %v4220_v47  ;;  %v4222_v32 = vpop.f32.mrb[7].mxu1  ;;  %v3453_v18 = vld [vmem:[%s4969_s3 + $0x60] sm:$0xff]  }
  0xf8   :  { %v4157_v2 = vadd.f32 %v647_v17, %v357_v6  ;;  %v649_v14 = vpop.f32.mrb[14].mxu0  ;;  %947 = vmatprep.subr.bf16.mxu1 %v851_v22  ;;  %5008 = vst [vmem:[#allocation10_spill] sm:$0xff] %v4222_v32  ;;  %v4224_v30 = vpop.f32.mrb[8].mxu1  ;;  %v3454_v6 = vld [vmem:[%s4969_s3 + $0x68] sm:$0xff]   ;;  %v3455_v22 = vld [vmem:[%s4969_s3 + $0x70] sm:$0xff]  }
  0xf9   :  { %v4161_v52 = vadd.f32 %v649_v14, %v358_v24  ;;  %v651_v28 = vpop.f32.mrb[15].mxu0  ;;  %948 = vmatpush1.bf16.msra.mxu1 %v850_v8  ;;  %v842_v36 = vmax.f32 %v4159_v26, 0.0  ;;  %5009 = vst [vmem:[#allocation11_spill] sm:$0xff] %v4224_v30  ;;  %v4226_v25 = vpop.f32.mrb[9].mxu1 }
  0xfa   :  { %v4166_v27 = vadd.f32 %v651_v28, %v359_v40  ;;  %2694 = vperm.xlu1 %3427, %v3192_v35   ;;  %v843_v12 = vmax.f32 %v4157_v2, 0.0  ;;  %5010 = vst [vmem:[#allocation12_spill] sm:$0xff] %v4226_v25  ;;  %v4228_v23 = vpop.f32.mrb[10].mxu1  ;;  %v873_v8 = vpop.permute.xlu1 %872 }
  0xfb   :  { %v844_v37 = vmax.f32 %v4161_v52, 0.0  ;;  %2972 = vmatmul.mubr.msk.bf16.gmra.mrb[40].mxu0 %vm510_vm2, %v3451_v42  ;;  %5011 = vst [vmem:[#allocation13_spill] sm:$0xff] %v4228_v23  ;;  %v4230_v11 = vpop.f32.mrb[11].mxu1 }
  0xfc   :  { %5000 = vst [vmem:[#allocation2_spill] sm:$0xff] %v4166_v27  ;;  %v845_v39 = vmax.f32 %v4166_v27, 0.0  ;;  %723 = vmatprep.mubr.bf16.mxu0 %v4976_v9  ;;  %5012 = vst [vmem:[#allocation14_spill] sm:$0xff] %v4230_v11  ;;  %v4232_v4 = vpop.f32.mrb[12].mxu1 }
  0xfd   :  { %v852_v33 = vpack.c.bf16 %v844_v37, %v842_v36  ;;  %5013 = vst [vmem:[#allocation15_spill] sm:$0xff] %v4232_v4  ;;  %v4234_v51 = vpop.f32.mrb[13].mxu1 }
  0xfe   :  { %v853_v38 = vpack.c.bf16 %v845_v39, %v843_v12  ;;  %2704 = vperm.xlu1 %3427, %v3194_v34   ;;  %5014 = vst [vmem:[#allocation16_spill] sm:$0xff] %v4234_v51  ;;  %v4236_v48 = vpop.f32.mrb[14].mxu1  ;;  %v878_v35 = vpop.permute.xlu1 %877 }
  0xff   :  { %5015 = vst [vmem:[#allocation17_spill] sm:$0xff] %v4236_v48  ;;  %v4238_v5 = vpop.f32.mrb[15].mxu1 }
 0x100   :  { %949 = vmatprep.subr.bf16.mxu1 %v853_v38  ;;  %5016 = vst [vmem:[#allocation18_spill] sm:$0xff] %v4238_v5 }
 0x101   :  { %950 = vmatpush1.bf16.msra.mxu1 %v852_v33  ;;  %v4240_v62 = vpop.f32.mrb[16].mxu1  ;;  %v883_v33 = vpop.permute.xlu0 %882 }
 0x102   :  { %2714 = vperm.xlu1 %3427, %v3196_v13   ;;  %5017 = vst [vmem:[#allocation19_spill] sm:$0xff] %v4240_v62  ;;  %v4242_v0 = vpop.f32.mrb[17].mxu1 }
 0x103   :  { %5018 = vst [vmem:[#allocation20_spill] sm:$0xff] %v4242_v0  ;;  %v4244_v58 = vpop.f32.mrb[18].mxu1  ;;  %2973 = vmatmul.mubr.msk.bf16.gmra.mrb[44].mxu0 %vm510_vm2, %v3452_v19 }
 0x104   :  { %2986 = vmatmul.mubr.msk.bf16.vlgmr.msra.gmra.mrb[20].mxu1 %vm930_vm3, %v3441_v41  ;;  %5019 = vst [vmem:[#allocation21_spill] sm:$0xff] %v4244_v58  ;;  %v4246_v29 = vpop.f32.mrb[19].mxu1  ;;  %733 = vmatprep.mubr.bf16.mxu0 %v4976_v9 }
 0x105   :  { %985 = vmatprep.mubr.bf16.mxu1 %v4976_v9  ;;  %5020 = vst [vmem:[#allocation22_spill] sm:$0xff] %v4246_v29 }
 0x106   :  { %2873 = vperm.xlu1 %3427, %v2869_v46  }
 0x10b   :  { %2974 = vmatmul.mubr.msk.bf16.gmra.mrb[48].mxu0 %vm510_vm2, %v3453_v18 }
 0x10c   :  { %2987 = vmatmul.mubr.msk.bf16.gmra.mrb[24].mxu1 %vm930_vm3, %v3442_v10  ;;  %743 = vmatprep.mubr.bf16.mxu0 %v4976_v9  ;;  %v888_v10 = vpop.permute.xlu1 %887 }
 0x10d   :  { %995 = vmatprep.mubr.bf16.mxu1 %v4976_v9 }
 0x113   :  { %2975 = vmatmul.mubr.msk.bf16.gmra.mrb[52].mxu0 %vm510_vm2, %v3454_v6 }
 0x114   :  { %2988 = vmatmul.mubr.msk.bf16.gmra.mrb[28].mxu1 %vm930_vm3, %v3443_v1  ;;  %753 = vmatprep.mubr.bf16.mxu0 %v4976_v9 }
 0x115   :  { %1005 = vmatprep.mubr.bf16.mxu1 %v4976_v9 }
 0x11b   :  { %2976 = vmatmul.mubr.msk.bf16.gmra.mrb[56].mxu0 %vm510_vm2, %v3455_v22 }
 0x11c   :  { %2989 = vmatmul.mubr.msk.bf16.gmra.mrb[32].mxu1 %vm930_vm3, %v3444_v3  ;;  %1162 = vmatprep.mubr.bf16.mxu0 %v4976_v9 }
 0x11d   :  { %1381 = vmatprep.mubr.bf16.mxu1 %v4976_v9 }
 0x1d7   :  { %v977_v15 = vpop.f32.mrb[20].mxu1 }
 0x1d8   :  { %v978_v17 = vadd.f32 %v977_v15, %v873_v8  ;;  %v979_v24 = vpop.f32.mrb[21].mxu1 }
 0x1d9   :  { %v980_v14 = vadd.f32 %v979_v24, %v873_v8  ;;  %v981_v40 = vpop.f32.mrb[22].mxu1 }
 0x1da   :  { %v982_v28 = vadd.f32 %v981_v40, %v878_v35  ;;  %v983_v31 = vpop.f32.mrb[23].mxu1  ;;  %v1016_v34 = vmax.f32 %v978_v17, 0.0 }
 0x1db   :  { %v984_v37 = vadd.f32 %v983_v31, %v878_v35  ;;  %v1017_v39 = vmax.f32 %v980_v14, 0.0  ;;  %v893_v35 = vpop.permute.xlu1 %892 }
 0x1dc   :  { %v1018_v12 = vmax.f32 %v982_v28, 0.0 }
 0x1dd   :  { %v1019_v36 = vmax.f32 %v984_v37, 0.0  ;;  %v898_v37 = vpop.permute.xlu0 %897 }
 0x1de   :  { %v1032_v38 = vpack.c.bf16 %v1018_v12, %v1016_v34 }
 0x1df   :  { %v1033_v13 = vpack.c.bf16 %v1019_v36, %v1017_v39  ;;  %v987_v41 = vpop.f32.mrb[24].mxu1 }
 0x1e0   :  { %v988_v42 = vadd.f32 %v987_v41, %v883_v33  ;;  %v989_v46 = vpop.f32.mrb[25].mxu1 }
 0x1e1   :  { %v990_v1 = vadd.f32 %v989_v46, %v883_v33  ;;  %v991_v3 = vpop.f32.mrb[26].mxu1  ;;  %1130 = vmatprep.subr.bf16.mxu0 %v1033_v13 }
 0x1e2   :  { %v992_v19 = vadd.f32 %v991_v3, %v888_v10  ;;  %v993_v18 = vpop.f32.mrb[27].mxu1  ;;  %1131 = vmatpush1.bf16.msra.mxu0 %v1032_v38  ;;  %v1020_v22 = vmax.f32 %v988_v42, 0.0 }
 0x1e3   :  { %v994_v6 = vadd.f32 %v993_v18, %v888_v10  ;;  %v1021_v15 = vmax.f32 %v990_v1, 0.0  ;;  %v903_v10 = vpop.permute.xlu1 %902 }
 0x1e4   :  { %v1022_v8 = vmax.f32 %v992_v19, 0.0 }
 0x1e5   :  { %v1023_v17 = vmax.f32 %v994_v6, 0.0  ;;  %v908_v6 = vpop.permute.xlu0 %907 }
 0x1e6   :  { %v1034_v24 = vpack.c.bf16 %v1022_v8, %v1020_v22 }
 0x1e7   :  { %v1035_v14 = vpack.c.bf16 %v1023_v17, %v1021_v15  ;;  %v997_v40 = vpop.f32.mrb[28].mxu1 }
 0x1e8   :  { %v998_v28 = vadd.f32 %v997_v40, %v893_v35  ;;  %v999_v31 = vpop.f32.mrb[29].mxu1 }
 0x1e9   :  { %v1000_v34 = vadd.f32 %v999_v31, %v893_v35  ;;  %v1001_v12 = vpop.f32.mrb[30].mxu1  ;;  %1132 = vmatprep.subr.bf16.mxu0 %v1035_v14 }
 0x1ea   :  { %v1002_v39 = vadd.f32 %v1001_v12, %v898_v37  ;;  %v1003_v36 = vpop.f32.mrb[31].mxu1  ;;  %1133 = vmatpush1.bf16.msra.mxu0 %v1034_v24  ;;  %v1024_v38 = vmax.f32 %v998_v28, 0.0  ;;  %v3457_v12 = vld [vmem:[%s4971_s4 + $0x28] sm:$0xff]  }
 0x1eb   :  { %v1004_v33 = vadd.f32 %v1003_v36, %v898_v37  ;;  %v1025_v41 = vmax.f32 %v1000_v34, 0.0  ;;  %v3456_v34 = vld [vmem:[%s4971_s4 + $0x20] sm:$0xff]   ;;  %v3459_v36 = vld [vmem:[%s4971_s4 + $0x38] sm:$0xff]  }
 0x1ec   :  { %v1026_v13 = vmax.f32 %v1002_v39, 0.0  ;;  %v3458_v39 = vld [vmem:[%s4971_s4 + $0x30] sm:$0xff]  }
 0x1ed   :  { %v1027_v42 = vmax.f32 %v1004_v33, 0.0  ;;  %v4288_v33 = vpop.permute.xlu1 %1060 }
 0x1ee   :  { %v1036_v46 = vpack.c.bf16 %v1026_v13, %v1024_v38  ;;  %v4290_v38 = vpop.permute.xlu0 %1065 }
 0x1ef   :  { %v1037_v1 = vpack.c.bf16 %v1027_v42, %v1025_v41  ;;  %v1007_v3 = vpop.f32.mrb[32].mxu1  ;;  %v3212_v41 = vadd.f32 %v4288_v33, %v4023_v60  ;;  %v3210_v42 = vadd.f32 %v4288_v33, %v4025_v59 }
 0x1f0   :  { %v1008_v19 = vadd.f32 %v1007_v3, %v903_v10  ;;  %v1009_v18 = vpop.f32.mrb[33].mxu1 }
 0x1f1   :  { %v1010_v22 = vadd.f32 %v1009_v18, %v903_v10  ;;  %v1011_v8 = vpop.f32.mrb[34].mxu1  ;;  %1134 = vmatprep.subr.bf16.mxu0 %v1037_v1  ;;  %v3214_v10 = vadd.f32 %v4290_v38, %v4027_v61 }
 0x1f2   :  { %v1012_v15 = vadd.f32 %v1011_v8, %v908_v6  ;;  %v1013_v17 = vpop.f32.mrb[35].mxu1  ;;  %1135 = vmatpush1.bf16.msra.mxu0 %v1036_v46  ;;  %v1028_v24 = vmax.f32 %v1008_v19, 0.0  ;;  %v3216_v19 = vadd.f32 %v4290_v38, %v4041_v7 }
 0x1f3   :  { %v1014_v35 = vadd.f32 %v1013_v17, %v908_v6  ;;  %v1029_v40 = vmax.f32 %v1010_v22, 0.0 }
 0x1f4   :  { %v1030_v14 = vmax.f32 %v1012_v15, 0.0  ;;  %v4320_v15 = vpop.permute.xlu1 %1070 }
 0x1f5   :  { %v1031_v28 = vmax.f32 %v1014_v35, 0.0  ;;  %v4323_v35 = vpop.permute.xlu0 %1075 }
 0x1f6   :  { %v1038_v31 = vpack.c.bf16 %v1030_v14, %v1028_v24 }
 0x1f7   :  { %v1039_v37 = vpack.c.bf16 %v1031_v28, %v1029_v40 }
 0x1f9   :  { %1136 = vmatprep.subr.bf16.mxu0 %v1039_v37 }
 0x1fa   :  { %1137 = vmatpush1.bf16.msra.mxu0 %v1038_v31  ;;  %v3220_v31 = vadd.f32 %v4320_v15, %v4077_v16 }
 0x1fd   :  { %3010 = vmatmul.mubr.msk.bf16.vlgmr.msra.gmra.mrb[16].mxu0 %vm930_vm3, %v3456_v34 }
 0x1fe   :  { %1172 = vmatprep.mubr.bf16.mxu0 %v4976_v9 }
 0x205   :  { %3011 = vmatmul.mubr.msk.bf16.gmra.mrb[20].mxu0 %vm930_vm3, %v3457_v12  ;;  %v3218_v12 = vadd.f32 %v4320_v15, %v4083_v57 }
 0x206   :  { %1182 = vmatprep.mubr.bf16.mxu0 %v4976_v9 }
 0x20d   :  { %3012 = vmatmul.mubr.msk.bf16.gmra.mrb[24].mxu0 %vm930_vm3, %v3458_v39 }
 0x20e   :  { %1192 = vmatprep.mubr.bf16.mxu0 %v4976_v9 }
 0x215   :  { %3013 = vmatmul.mubr.msk.bf16.gmra.mrb[28].mxu0 %vm930_vm3, %v3459_v36  ;;  %v3222_v36 = vadd.f32 %v4323_v35, %v4085_v55 }
 0x216   :  { %1568 = vmatprep.mubr.bf16.mxu0 %v4976_v9 }
 0x2d0   :  { %v4292_v13 = vpop.f32.mrb[16].mxu0 }
 0x2d1   :  { %v4298_v46 = vpop.f32.mrb[17].mxu0  ;;  %v4310_v18 = vadd.f32 %v3210_v42, %v4292_v13 }
 0x2d2   :  { %v4303_v1 = vadd.f32 %v3212_v41, %v4298_v46  ;;  %v4305_v3 = vpop.f32.mrb[18].mxu0 }
 0x2d3   :  { %5022 = vst [vmem:[#allocation24_spill] sm:$0xff] %v4310_v18  ;;  %v4313_v6 = vadd.f32 %v3214_v10, %v4305_v3  ;;  %v4315_v22 = vpop.f32.mrb[19].mxu0  ;;  %v1235_v40 = vmax.f32 %v4310_v18, 0.0  ;;  %v3224_v10 = vadd.f32 %v4323_v35, %v4099_v63 }
 0x2d4   :  { %5021 = vst [vmem:[#allocation23_spill] sm:$0xff] %v4303_v1  ;;  %v4318_v8 = vadd.f32 %v3216_v19, %v4315_v22  ;;  %v1236_v24 = vmax.f32 %v4303_v1, 0.0 }
 0x2d5   :  { %5023 = vst [vmem:[#allocation25_spill] sm:$0xff] %v4313_v6  ;;  %v1237_v17 = vmax.f32 %v4313_v6, 0.0 }
 0x2d6   :  { %5024 = vst [vmem:[#allocation26_spill] sm:$0xff] %v4318_v8  ;;  %v1238_v14 = vmax.f32 %v4318_v8, 0.0 }
 0x2d7   :  { %v1251_v34 = vpack.c.bf16 %v1237_v17, %v1235_v40  ;;  %v4356_v40 = vpop.permute.xlu1 %1080 }
 0x2d8   :  { %v4328_v28 = vpop.f32.mrb[20].mxu0  ;;  %v1252_v37 = vpack.c.bf16 %v1238_v14, %v1236_v24  ;;  %v3226_v0 = vadd.f32 %v4356_v40, %v4131_v56 }
 0x2d9   :  { %v4334_v39 = vpop.f32.mrb[21].mxu0  ;;  %v4346_v19 = vadd.f32 %v3218_v12, %v4328_v28 }
 0x2da   :  { %v4339_v41 = vadd.f32 %v3220_v31, %v4334_v39  ;;  %v4341_v42 = vpop.f32.mrb[22].mxu0  ;;  %1349 = vmatprep.subr.bf16.mxu1 %v1252_v37  ;;  %v4359_v37 = vpop.permute.xlu0 %1085 }
 0x2db   :  { %5026 = vst [vmem:[#allocation28_spill] sm:$0xff] %v4346_v19  ;;  %v4349_v17 = vadd.f32 %v3222_v36, %v4341_v42  ;;  %v4351_v24 = vpop.f32.mrb[23].mxu0  ;;  %1350 = vmatpush1.bf16.msra.mxu1 %v1251_v34  ;;  %v1239_v29 = vmax.f32 %v4346_v19, 0.0  ;;  %v3228_v34 = vadd.f32 %v4356_v40, %v4126_v50  ;;  %v3230_v5 = vadd.f32 %v4359_v37, %v4133_v21 }
 0x2dc   :  { %5025 = vst [vmem:[#allocation27_spill] sm:$0xff] %v4339_v41  ;;  %v4354_v14 = vadd.f32 %v3224_v10, %v4351_v24  ;;  %v1240_v9 = vmax.f32 %v4339_v41, 0.0  ;;  %v3232_v4 = vadd.f32 %v4359_v37, %v4140_v43 }
 0x2dd   :  { %5027 = vst [vmem:[#allocation29_spill] sm:$0xff] %v4349_v17  ;;  %v1241_v31 = vmax.f32 %v4349_v17, 0.0 }
 0x2de   :  { %5028 = vst [vmem:[#allocation30_spill] sm:$0xff] %v4354_v14  ;;  %v1242_v12 = vmax.f32 %v4354_v14, 0.0 }
 0x2df   :  { %v1253_v10 = vpack.c.bf16 %v1241_v31, %v1239_v29 }
 0x2e0   :  { %v4364_v36 = vpop.f32.mrb[24].mxu0  ;;  %v1254_v58 = vpack.c.bf16 %v1242_v12, %v1240_v9 }
 0x2e1   :  { %v4370_v62 = vpop.f32.mrb[25].mxu0  ;;  %v4382_v9 = vadd.f32 %v3226_v0, %v4364_v36 }
 0x2e2   :  { %v4375_v48 = vadd.f32 %v3228_v34, %v4370_v62  ;;  %v4377_v51 = vpop.f32.mrb[26].mxu0  ;;  %1351 = vmatprep.subr.bf16.mxu1 %v1254_v58  ;;  %v4392_v34 = vpop.permute.xlu1 %1090 }
 0x2e3   :  { %5030 = vst [vmem:[#allocation32_spill] sm:$0xff] %v4382_v9  ;;  %v4385_v29 = vadd.f32 %v3230_v5, %v4377_v51  ;;  %v4387_v31 = vpop.f32.mrb[27].mxu0  ;;  %1352 = vmatpush1.bf16.msra.mxu1 %v1253_v10  ;;  %v4395_v58 = vpop.permute.xlu0 %1095  ;;  %v1243_v25 = vmax.f32 %v4382_v9, 0.0  ;;  %v3236_v10 = vadd.f32 %v4392_v34, %v4157_v2  ;;  %v3234_v32 = vadd.f32 %v4392_v34, %v4159_v26 }
 0x2e4   :  { %5029 = vst [vmem:[#allocation31_spill] sm:$0xff] %v4375_v48  ;;  %v4390_v12 = vadd.f32 %v3232_v4, %v4387_v31  ;;  %v1244_v23 = vmax.f32 %v4375_v48, 0.0  ;;  %v3238_v54 = vadd.f32 %v4395_v58, %v4161_v52 }
 0x2e5   :  { %5031 = vst [vmem:[#allocation33_spill] sm:$0xff] %v4385_v29  ;;  %v1245_v11 = vmax.f32 %v4385_v29, 0.0  ;;  %v3240_v29 = vadd.f32 %v4395_v58, %v4166_v27 }
 0x2e6   :  { %5032 = vst [vmem:[#allocation34_spill] sm:$0xff] %v4390_v12  ;;  %v1246_v0 = vmax.f32 %v4390_v12, 0.0 }
 0x2e7   :  { %v1255_v4 = vpack.c.bf16 %v1245_v11, %v1243_v25 }
 0x2e8   :  { %v4400_v5 = vpop.f32.mrb[28].mxu0  ;;  %v1256_v30 = vpack.c.bf16 %v1246_v0, %v1244_v23 }
 0x2e9   :  { %v4406_v47 = vpop.f32.mrb[29].mxu0  ;;  %v4418_v23 = vadd.f32 %v3234_v32, %v4400_v5 }
 0x2ea   :  { %v4411_v53 = vadd.f32 %v3236_v10, %v4406_v47  ;;  %v4413_v12 = vpop.f32.mrb[30].mxu0  ;;  %1353 = vmatprep.subr.bf16.mxu1 %v1256_v30 }
 0x2eb   :  { %5034 = vst [vmem:[#allocation36_spill] sm:$0xff] %v4418_v23  ;;  %v4421_v25 = vadd.f32 %v3238_v54, %v4413_v12  ;;  %v4423_v11 = vpop.f32.mrb[31].mxu0  ;;  %1354 = vmatpush1.bf16.msra.mxu1 %v1255_v4  ;;  %v1247_v9 = vmax.f32 %v4418_v23, 0.0  ;;  %v3460_v54 = vld [vmem:[%s4971_s4 + $0x40] sm:$0xff]   ;;  %v3461_v4 = vld [vmem:[%s4971_s4 + $0x48] sm:$0xff]  }
 0x2ec   :  { %5033 = vst [vmem:[#allocation35_spill] sm:$0xff] %v4411_v53  ;;  %v4426_v0 = vadd.f32 %v3240_v29, %v4423_v11  ;;  %v1248_v48 = vmax.f32 %v4411_v53, 0.0  ;;  %v5037_v29 = vmov 0  }
 0x2ed   :  { %5035 = vst [vmem:[#allocation37_spill] sm:$0xff] %v4421_v25  ;;  %v1249_v10 = vmax.f32 %v4421_v25, 0.0 }
 0x2ee   :  { %5036 = vst [vmem:[#allocation38_spill] sm:$0xff] %v4426_v0  ;;  %v1250_v30 = vmax.f32 %v4426_v0, 0.0 }
 0x2ef   :  { %v1257_v32 = vpack.c.bf16 %v1249_v10, %v1247_v9  ;;  %v1280_v9 = vpop.permute.xlu1 %1279 }
 0x2f0   :  { %v1258_v14 = vpack.c.bf16 %v1250_v30, %v1248_v48  ;;  %v3462_v48 = vld [vmem:[%s4971_s4 + $0x50] sm:$0xff]  }
 0x2f2   :  { %1355 = vmatprep.subr.bf16.mxu1 %v1258_v14  ;;  %v3463_v14 = vld [vmem:[%s4971_s4 + $0x58] sm:$0xff]  }
 0x2f3   :  { %1356 = vmatpush1.bf16.msra.mxu1 %v1257_v32  ;;  %v1290_v49 = vpop.permute.xlu1 %1289 }
 0x2f6   :  { %3034 = vmatmul.mubr.msk.bf16.vlgmr.msra.gmra.mrb[36].mxu1 %vm930_vm3, %v3460_v54  ;;  %v1285_v54 = vpop.permute.xlu0 %1284 }
 0x2f7   :  { %1391 = vmatprep.mubr.bf16.mxu1 %v5037_v29 }
 0x2fa   :  { %v1295_v25 = vpop.permute.xlu0 %1294 }
 0x2fe   :  { %3035 = vmatmul.mubr.msk.bf16.gmra.mrb[40].mxu1 %vm930_vm3, %v3461_v4 }
 0x2ff   :  { %1401 = vmatprep.mubr.bf16.mxu1 %v5037_v29 }
 0x306   :  { %3036 = vmatmul.mubr.msk.bf16.gmra.mrb[44].mxu1 %vm930_vm3, %v3462_v48 }
 0x307   :  { %1411 = vmatprep.mubr.bf16.mxu1 %v5037_v29 }
 0x30e   :  { %3037 = vmatmul.mubr.msk.bf16.gmra.mrb[48].mxu1 %vm930_vm3, %v3463_v14 }
 0x30f   :  { %1787 = vmatprep.mubr.bf16.mxu1 %v5037_v29 }
 0x3c9   :  { %v1383_v10 = vpop.f32.mrb[36].mxu1 }
 0x3ca   :  { %v1384_v30 = vadd.f32 %v1383_v10, %v1280_v9  ;;  %v1385_v32 = vpop.f32.mrb[37].mxu1 }
 0x3cb   :  { %v1386_v4 = vadd.f32 %v1385_v32, %v1280_v9  ;;  %v1387_v17 = vpop.f32.mrb[38].mxu1 }
 0x3cc   :  { %v1388_v41 = vadd.f32 %v1387_v17, %v1285_v54  ;;  %v1389_v19 = vpop.f32.mrb[39].mxu1  ;;  %v1422_v8 = vmax.f32 %v1384_v30, 0.0 }
 0x3cd   :  { %v1390_v48 = vadd.f32 %v1389_v19, %v1285_v54  ;;  %v1423_v1 = vmax.f32 %v1386_v4, 0.0  ;;  %v1300_v4 = vpop.permute.xlu1 %1299 }
 0x3ce   :  { %v1424_v6 = vmax.f32 %v1388_v41, 0.0 }
 0x3cf   :  { %v1425_v18 = vmax.f32 %v1390_v48, 0.0  ;;  %v1305_v48 = vpop.permute.xlu0 %1304 }
 0x3d0   :  { %v1438_v20 = vpack.c.bf16 %v1424_v6, %v1422_v8 }
 0x3d1   :  { %v1439_v44 = vpack.c.bf16 %v1425_v18, %v1423_v1  ;;  %v1393_v14 = vpop.f32.mrb[40].mxu1 }
 0x3d2   :  { %v1394_v45 = vadd.f32 %v1393_v14, %v1290_v49  ;;  %v1395_v0 = vpop.f32.mrb[41].mxu1 }
 0x3d3   :  { %v1396_v53 = vadd.f32 %v1395_v0, %v1290_v49  ;;  %v1397_v10 = vpop.f32.mrb[42].mxu1  ;;  %1536 = vmatprep.subr.bf16.mxu0 %v1439_v44 }
 0x3d4   :  { %v1398_v23 = vadd.f32 %v1397_v10, %v1295_v25  ;;  %v1399_v9 = vpop.f32.mrb[43].mxu1  ;;  %1537 = vmatpush1.bf16.msra.mxu0 %v1438_v20  ;;  %v1426_v32 = vmax.f32 %v1394_v45, 0.0  ;;  %v1310_v10 = vpop.permute.xlu1 %1309 }
 0x3d5   :  { %v1400_v17 = vadd.f32 %v1399_v9, %v1295_v25  ;;  %v1427_v30 = vmax.f32 %v1396_v53, 0.0 }
 0x3d6   :  { %v1428_v19 = vmax.f32 %v1398_v23, 0.0 }
 0x3d7   :  { %v1429_v41 = vmax.f32 %v1400_v17, 0.0 }
 0x3d8   :  { %v1440_v54 = vpack.c.bf16 %v1428_v19, %v1426_v32 }
 0x3d9   :  { %v1441_v6 = vpack.c.bf16 %v1429_v41, %v1427_v30  ;;  %v1403_v8 = vpop.f32.mrb[44].mxu1  ;;  %v1315_v30 = vpop.permute.xlu0 %1314 }
 0x3da   :  { %v1404_v1 = vadd.f32 %v1403_v8, %v1300_v4  ;;  %v1405_v18 = vpop.f32.mrb[45].mxu1 }
 0x3db   :  { %v1406_v14 = vadd.f32 %v1405_v18, %v1300_v4  ;;  %v1407_v27 = vpop.f32.mrb[46].mxu1  ;;  %1538 = vmatprep.subr.bf16.mxu0 %v1441_v6 }
 0x3dc   :  { %v1408_v49 = vadd.f32 %v1407_v27, %v1305_v48  ;;  %v1409_v44 = vpop.f32.mrb[47].mxu1  ;;  %1539 = vmatpush1.bf16.msra.mxu0 %v1440_v54  ;;  %v1430_v20 = vmax.f32 %v1404_v1, 0.0 }
 0x3dd   :  { %v1410_v0 = vadd.f32 %v1409_v44, %v1305_v48  ;;  %v1431_v45 = vmax.f32 %v1406_v14, 0.0  ;;  %v3464_v44 = vld [vmem:[%s4971_s4 + $0x60] sm:$0xff]  }
 0x3de   :  { %v1432_v25 = vmax.f32 %v1408_v49, 0.0 }
 0x3df   :  { %v1433_v23 = vmax.f32 %v1410_v0, 0.0  ;;  %v3465_v0 = vld [vmem:[%s4971_s4 + $0x68] sm:$0xff]  }
 0x3e0   :  { %v1442_v53 = vpack.c.bf16 %v1432_v25, %v1430_v20  ;;  %v3466_v20 = vld [vmem:[%s4971_s4 + $0x70] sm:$0xff]   ;;  %v3467_v25 = vld [vmem:[%s4971_s4 + $0x78] sm:$0xff]  }
 0x3e1   :  { %v1443_v9 = vpack.c.bf16 %v1433_v23, %v1431_v45  ;;  %v1413_v17 = vpop.f32.mrb[48].mxu1  ;;  %v1165_v45 = vadd.f32 %v4292_v13, %v4288_v33  ;;  %v1167_v23 = vadd.f32 %v4298_v46, %v4288_v33  ;;  %v1175_v13 = vadd.f32 %v4328_v28, %v4320_v15 }
 0x3e2   :  { %v1414_v32 = vadd.f32 %v1413_v17, %v1310_v10  ;;  %v1415_v19 = vpop.f32.mrb[49].mxu1  ;;  %v1177_v33 = vadd.f32 %v4334_v39, %v4320_v15 }
 0x3e3   :  { %v1416_v41 = vadd.f32 %v1415_v19, %v1310_v10  ;;  %v1417_v8 = vpop.f32.mrb[50].mxu1  ;;  %1540 = vmatprep.subr.bf16.mxu0 %v1443_v9  ;;  %v1171_v10 = vadd.f32 %v4315_v22, %v4290_v38  ;;  %v1203_v9 = vadd.f32 %v1165_v45, %v4025_v59  ;;  %v1204_v17 = vadd.f32 %v1167_v23, %v4023_v60  ;;  %v4496_v22 = vpop.permute.xlu0 %1471 }
 0x3e4   :  { %v1418_v4 = vadd.f32 %v1417_v8, %v1315_v30  ;;  %v1419_v6 = vpop.f32.mrb[51].mxu1  ;;  %1541 = vmatpush1.bf16.msra.mxu0 %v1442_v53  ;;  %v1434_v54 = vmax.f32 %v1414_v32, 0.0  ;;  %v1169_v53 = vadd.f32 %v4305_v3, %v4290_v38  ;;  %v1179_v38 = vadd.f32 %v4341_v42, %v4323_v35  ;;  %v4490_v3 = vpop.permute.xlu1 %1466 }
 0x3e5   :  { %v1420_v27 = vadd.f32 %v1419_v6, %v1315_v30  ;;  %v1435_v1 = vmax.f32 %v1416_v41, 0.0  ;;  %v1206_v19 = vadd.f32 %v1171_v10, %v4041_v7  ;;  %v1219_v30 = vadd.f32 nan, %v1203_v9 }
 0x3e6   :  { %v1436_v18 = vmax.f32 %v1418_v4, 0.0  ;;  %v1205_v32 = vadd.f32 %v1169_v53, %v4027_v61  ;;  %v1220_v41 = vadd.f32 nan, %v1204_v17  ;;  %v1181_v60 = vadd.f32 %v4351_v24, %v4323_v35 }
 0x3e7   :  { %v1437_v48 = vmax.f32 %v1420_v27, 0.0  ;;  %v1222_v59 = vadd.f32 nan, %v1206_v19  ;;  %v1207_v61 = vadd.f32 %v1175_v13, %v4083_v57  ;;  %v3242_v7 = vadd.f32 %v4490_v3, %v1219_v30  ;;  %v4540_v53 = vpop.permute.xlu0 %1481 }
 0x3e8   :  { %v1444_v14 = vpack.c.bf16 %v1436_v18, %v1434_v54  ;;  %v1221_v46 = vadd.f32 nan, %v1205_v32  ;;  %v1208_v28 = vadd.f32 %v1177_v33, %v4077_v16  ;;  %v3244_v15 = vadd.f32 %v4490_v3, %v1220_v41 }
 0x3e9   :  { %v1445_v49 = vpack.c.bf16 %v1437_v48, %v1435_v1  ;;  %v1209_v39 = vadd.f32 %v1179_v38, %v4085_v55  ;;  %v1210_v57 = vadd.f32 %v1181_v60, %v4099_v63  ;;  %v3248_v16 = vadd.f32 %v4496_v22, %v1222_v59 }
 0x3ea   :  { %v3246_v35 = vadd.f32 %v4496_v22, %v1221_v46  ;;  %v1223_v27 = vadd.f32 nan, %v1207_v61  ;;  %v1185_v55 = vadd.f32 %v4364_v36, %v4356_v40  ;;  %v1224_v1 = vadd.f32 nan, %v1208_v28 }
 0x3eb   :  { %1542 = vmatprep.subr.bf16.mxu0 %v1445_v49  ;;  %v1187_v63 = vadd.f32 %v4370_v62, %v4356_v40  ;;  %v1189_v49 = vadd.f32 %v4377_v51, %v4359_v37  ;;  %v1226_v36 = vadd.f32 nan, %v1210_v57 }
 0x3ec   :  { %1543 = vmatpush1.bf16.msra.mxu0 %v1444_v14  ;;  %v1225_v14 = vadd.f32 nan, %v1209_v39  ;;  %v1211_v62 = vadd.f32 %v1185_v55, %v4131_v56  ;;  %v1201_v39 = vadd.f32 %v4423_v11, %v4395_v58 }
 0x3ed   :  { %v1212_v51 = vadd.f32 %v1187_v63, %v4126_v50  ;;  %v3256_v41 = vadd.f32 %v4540_v53, %v1226_v36 }
 0x3ee   :  { %v3254_v19 = vadd.f32 %v4540_v53, %v1225_v14  ;;  %v1227_v33 = vadd.f32 nan, %v1211_v62 }
 0x3ef   :  { %3058 = vmatmul.mubr.msk.bf16.vlgmr.msra.gmra.mrb[32].mxu0 %vm930_vm3, %v3464_v44  ;;  %v1228_v59 = vadd.f32 nan, %v1212_v51 }
 0x3f0   :  { %1578 = vmatprep.mubr.bf16.mxu0 %v5037_v29 }
 0x3f7   :  { %3059 = vmatmul.mubr.msk.bf16.gmra.mrb[36].mxu0 %vm930_vm3, %v3465_v0  ;;  %v4531_v0 = vpop.permute.xlu1 %1476 }
 0x3f8   :  { %1588 = vmatprep.mubr.bf16.mxu0 %v5037_v29  ;;  %v3250_v23 = vadd.f32 %v4531_v0, %v1223_v27  ;;  %v3252_v9 = vadd.f32 %v4531_v0, %v1224_v1  ;;  %v4584_v27 = vpop.permute.xlu0 %1491 }
 0x3ff   :  { %3060 = vmatmul.mubr.msk.bf16.gmra.mrb[40].mxu0 %vm930_vm3, %v3466_v20  ;;  %v1191_v20 = vadd.f32 %v4387_v31, %v4359_v37  ;;  %v1213_v37 = vadd.f32 %v1189_v49, %v4133_v21  ;;  %v1195_v21 = vadd.f32 %v4400_v5, %v4392_v34  ;;  %v4575_v5 = vpop.permute.xlu1 %1486 }
 0x400   :  { %1598 = vmatprep.mubr.bf16.mxu0 %v5037_v29  ;;  %v3260_v1 = vadd.f32 %v4575_v5, %v1228_v59 }
 0x401   :  { %v1214_v30 = vadd.f32 %v1191_v20, %v4140_v43  ;;  %v1197_v43 = vadd.f32 %v4406_v47, %v4392_v34  ;;  %v1229_v61 = vadd.f32 nan, %v1213_v37  ;;  %v1215_v47 = vadd.f32 %v1195_v21, %v4159_v26 }
 0x403   :  { %v3262_v49 = vadd.f32 %v4584_v27, %v1229_v61 }
 0x407   :  { %3061 = vmatmul.mubr.msk.bf16.gmra.mrb[44].mxu0 %vm930_vm3, %v3467_v25 }
 0x408   :  { %1974 = vmatprep.mubr.bf16.mxu0 %v5037_v29 }
 0x4c2   :  { %v4499_v8 = vpop.f32.mrb[32].mxu0 }
 0x4c3   :  { %v4504_v42 = vadd.f32 %v3242_v7, %v4499_v8  ;;  %v4506_v4 = vpop.f32.mrb[33].mxu0  ;;  %v1199_v7 = vadd.f32 %v4413_v12, %v4395_v58  ;;  %v1216_v12 = vadd.f32 %v1197_v43, %v4157_v2 }
 0x4c4   :  { %v4511_v24 = vadd.f32 %v3244_v15, %v4506_v4  ;;  %v4513_v6 = vpop.f32.mrb[34].mxu0  ;;  %v1230_v15 = vadd.f32 nan, %v1214_v30 }
 0x4c5   :  { %v4519_v54 = vadd.f32 %v3246_v35, %v4513_v6  ;;  %v4521_v18 = vpop.f32.mrb[35].mxu0  ;;  %v1641_v40 = vmax.f32 %v4504_v42, 0.0  ;;  %v1217_v58 = vadd.f32 %v1199_v7, %v4161_v52 }
 0x4c6   :  { %v4526_v48 = vadd.f32 %v3248_v16, %v4521_v18  ;;  %v1642_v25 = vmax.f32 %v4511_v24, 0.0  ;;  %v3258_v16 = vadd.f32 %v4575_v5, %v1227_v33  ;;  %v1502_v33 = vpop.permute.xlu0 %1501 }
 0x4c7   :  { %v1643_v44 = vmax.f32 %v4519_v54, 0.0  ;;  %v1233_v51 = vadd.f32 nan, %v1217_v58 }
 0x4c8   :  { %v1644_v45 = vmax.f32 %v4526_v48, 0.0 }
 0x4c9   :  { %v1657_v31 = vpack.c.bf16 %v1643_v44, %v1641_v40  ;;  %v5038_v44 = vld [vmem:[#allocation2_spill] sm:$0xff]  ;;  %v1232_v40 = vadd.f32 nan, %v1216_v12 }
 0x4ca   :  { %v4543_v10 = vpop.f32.mrb[36].mxu0  ;;  %v1658_v17 = vpack.c.bf16 %v1644_v45, %v1642_v25  ;;  %v1218_v36 = vadd.f32 %v1201_v39, %v5038_v44  ;;  %v3264_v25 = vadd.f32 %v4584_v27, %v1230_v15  ;;  %v1231_v45 = vadd.f32 nan, %v1215_v47 }
 0x4cb   :  { %v4548_v32 = vadd.f32 %v3250_v23, %v4543_v10  ;;  %v4550_v56 = vpop.f32.mrb[37].mxu0  ;;  %v3270_v39 = vadd.f32 %v1502_v33, %v1233_v51 }
 0x4cc   :  { %v4555_v13 = vadd.f32 %v3252_v9, %v4550_v56  ;;  %v4557_v50 = vpop.f32.mrb[38].mxu0  ;;  %1755 = vmatprep.subr.bf16.mxu1 %v1658_v17  ;;  %v1497_v17 = vpop.permute.xlu1 %1496  ;;  %v1234_v37 = vadd.f32 nan, %v1218_v36 }
 0x4cd   :  { %v4563_v46 = vadd.f32 %v3254_v19, %v4557_v50  ;;  %v4565_v38 = vpop.f32.mrb[39].mxu0  ;;  %1756 = vmatpush1.bf16.msra.mxu1 %v1657_v31  ;;  %v1645_v34 = vmax.f32 %v4548_v32, 0.0  ;;  %v3268_v59 = vadd.f32 %v1497_v17, %v1232_v40 }
 0x4ce   :  { %v4570_v60 = vadd.f32 %v3256_v41, %v4565_v38  ;;  %v1646_v35 = vmax.f32 %v4555_v13, 0.0  ;;  %v3266_v41 = vadd.f32 %v1497_v17, %v1231_v45  ;;  %v5042_v45 = vld [vmem:[#allocation37_spill] sm:$0xff] }
 0x4cf   :  { %v1647_v28 = vmax.f32 %v4563_v46, 0.0 }
 0x4d0   :  { %v1648_v57 = vmax.f32 %v4570_v60, 0.0 }
 0x4d1   :  { %v1659_v11 = vpack.c.bf16 %v1647_v28, %v1645_v34  ;;  %v3272_v34 = vadd.f32 %v1502_v33, %v1234_v37  ;;  %v5043_v37 = vld [vmem:[#allocation38_spill] sm:$0xff] }
 0x4d2   :  { %v4587_v55 = vpop.f32.mrb[40].mxu0  ;;  %v1660_v63 = vpack.c.bf16 %v1648_v57, %v1646_v35 }
 0x4d3   :  { %v4592_v14 = vadd.f32 %v3258_v16, %v4587_v55  ;;  %v4594_v26 = vpop.f32.mrb[41].mxu0  ;;  %v5039_v16 = vld [vmem:[#allocation36_spill] sm:$0xff] }
 0x4d4   :  { %v4599_v20 = vadd.f32 %v3260_v1, %v4594_v26  ;;  %v4601_v2 = vpop.f32.mrb[42].mxu0  ;;  %1757 = vmatprep.subr.bf16.mxu1 %v1660_v63 }
 0x4d5   :  { %v4605_v52 = vadd.f32 %v3262_v49, %v4601_v2  ;;  %v4607_v62 = vpop.f32.mrb[43].mxu0  ;;  %1758 = vmatpush1.bf16.msra.mxu1 %v1659_v11  ;;  %v1649_v30 = vmax.f32 %v4592_v14, 0.0  ;;  %v5040_v11 = vld [vmem:[#allocation35_spill] sm:$0xff] }
 0x4d6   :  { %v4610_v23 = vadd.f32 %v3264_v25, %v4607_v62  ;;  %v1650_v31 = vmax.f32 %v4599_v20, 0.0 }
 0x4d7   :  { %v1651_v9 = vmax.f32 %v4605_v52, 0.0 }
 0x4d8   :  { %v1652_v19 = vmax.f32 %v4610_v23, 0.0 }
 0x4d9   :  { %v1661_v61 = vpack.c.bf16 %v1651_v9, %v1649_v30 }
 0x4da   :  { %v1600_v21 = vpop.f32.mrb[44].mxu0  ;;  %v1662_v43 = vpack.c.bf16 %v1652_v19, %v1650_v31 }
 0x4db   :  { %v1601_v7 = vadd.f32 %v1600_v21, %v1497_v17  ;;  %v4616_v28 = vadd.f32 %v3266_v41, %v1600_v21  ;;  %v1602_v15 = vpop.f32.mrb[45].mxu0  ;;  %v5044_v21 = vld [vmem:[#allocation3_spill] sm:$0xff] }
 0x4dc   :  { %v1603_v35 = vadd.f32 %v1602_v15, %v1497_v17  ;;  %v4618_v57 = vadd.f32 %v3268_v59, %v1602_v15  ;;  %v1604_v47 = vpop.f32.mrb[46].mxu0  ;;  %1759 = vmatprep.subr.bf16.mxu1 %v1662_v43 }
 0x4dd   :  { %v1621_v12 = vadd.f32 %v5039_v16, %v1601_v7  ;;  %v1605_v1 = vadd.f32 %v1604_v47, %v1502_v33  ;;  %v4621_v63 = vadd.f32 %v3270_v39, %v1604_v47  ;;  %v1606_v58 = vpop.f32.mrb[47].mxu0  ;;  %1760 = vmatpush1.bf16.msra.mxu1 %v1661_v61  ;;  %v1653_v30 = vmax.f32 %v4616_v28, 0.0  ;;  %v5045_v61 = vld [vmem:[#allocation4_spill] sm:$0xff]  ;;  %v5046_v39 = vld [vmem:[#allocation5_spill] sm:$0xff]  ;;  %v3468_v47 = vld [vmem:[%s4971_s4 + $0x80] sm:$0xff]  }
 0x4de   :  { %v1622_v49 = vadd.f32 %v5040_v11, %v1603_v35  ;;  %v1607_v44 = vadd.f32 %v1606_v58, %v1502_v33  ;;  %v4624_v36 = vadd.f32 %v3272_v34, %v1606_v58  ;;  %v1654_v17 = vmax.f32 %v4618_v57, 0.0  ;;  %v5047_v34 = vld [vmem:[#allocation6_spill] sm:$0xff]  ;;  %v3471_v58 = vld [vmem:[%s4971_s4 + $0x98] sm:$0xff]   ;;  %v1686_v11 = vpop.permute.xlu1 %1685 }
 0x4df   :  { %v1637_v25 = vadd.f32 nan, %v1621_v12  ;;  %v1623_v40 = vadd.f32 %v5042_v45, %v1605_v1  ;;  %v1655_v51 = vmax.f32 %v4621_v63, 0.0  ;;  %v3469_v12 = vld [vmem:[%s4971_s4 + $0x88] sm:$0xff]   ;;  %v3470_v1 = vld [vmem:[%s4971_s4 + $0x90] sm:$0xff]   ;;  %v1691_v45 = vpop.permute.xlu0 %1690 }
 0x4e0   :  { %5041 = vst [vmem:[#allocation2_spill] sm:$0xff] %v4624_v36  ;;  %v1638_v9 = vadd.f32 nan, %v1622_v49  ;;  %v1624_v31 = vadd.f32 %v5043_v37, %v1607_v44  ;;  %v1656_v19 = vmax.f32 %v4624_v36, 0.0 }
 0x4e1   :  { %v1639_v41 = vadd.f32 nan, %v1623_v40  ;;  %v4633_v59 = vadd.f32 %v1637_v25, %v5044_v21  ;;  %v1663_v15 = vpack.c.bf16 %v1655_v51, %v1653_v30 }
 0x4e2   :  { %v1640_v33 = vadd.f32 nan, %v1624_v31  ;;  %v1664_v43 = vpack.c.bf16 %v1656_v19, %v1654_v17  ;;  %v4636_v7 = vadd.f32 %v1638_v9, %v5045_v61 }
 0x4e3   :  { %v4639_v35 = vadd.f32 %v1639_v41, %v5046_v39 }
 0x4e4   :  { %1761 = vmatprep.subr.bf16.mxu1 %v1664_v43  ;;  %v4645_v16 = vadd.f32 %v1640_v33, %v5047_v34  ;;  %v1696_v43 = vpop.permute.xlu1 %1695 }
 0x4e5   :  { %1762 = vmatpush1.bf16.msra.mxu1 %v1663_v15 }
 0x4e8   :  { %3082 = vmatmul.mubr.msk.bf16.vlgmr.msra.gmra.mrb[52].mxu1 %vm930_vm3, %v3468_v47 }
 0x4e9   :  { %1797 = vmatprep.mubr.bf16.mxu1 %v5037_v29 }
 0x4f0   :  { %3083 = vmatmul.mubr.msk.bf16.gmra.mrb[56].mxu1 %vm930_vm3, %v3469_v12 }
 0x4f1   :  { %1807 = vmatprep.mubr.bf16.mxu1 %v5037_v29 }
 0x4f8   :  { %3084 = vmatmul.mubr.msk.bf16.gmra.mrb[60].mxu1 %vm930_vm3, %v3470_v1 }
 0x4f9   :  { %1817 = vmatprep.mubr.bf16.mxu1 %v5037_v29 }
 0x500   :  { %3085 = vmatmul.mubr.msk.bf16.gmra.mrb[64].mxu1 %vm930_vm3, %v3471_v58  ;;  %v1701_v58 = vpop.permute.xlu0 %1700 }
 0x501   :  { %2193 = vmatprep.mubr.bf16.mxu1 %v5037_v29 }
 0x5bb   :  { %v1789_v49 = vpop.f32.mrb[52].mxu1 }
 0x5bc   :  { %v1790_v44 = vadd.f32 %v1789_v49, %v1686_v11  ;;  %v1791_v25 = vpop.f32.mrb[53].mxu1 }
 0x5bd   :  { %v1792_v40 = vadd.f32 %v1791_v25, %v1686_v11  ;;  %v1793_v51 = vpop.f32.mrb[54].mxu1 }
 0x5be   :  { %v1794_v9 = vadd.f32 %v1793_v51, %v1691_v45  ;;  %v1795_v17 = vpop.f32.mrb[55].mxu1  ;;  %v1828_v31 = vmax.f32 %v1790_v44, 0.0 }
 0x5bf   :  { %v1796_v37 = vadd.f32 %v1795_v17, %v1691_v45  ;;  %v1829_v30 = vmax.f32 %v1792_v40, 0.0  ;;  %v1706_v17 = vpop.permute.xlu1 %1705 }
 0x5c0   :  { %v1830_v19 = vmax.f32 %v1794_v9, 0.0 }
 0x5c1   :  { %v1831_v41 = vmax.f32 %v1796_v37, 0.0 }
 0x5c2   :  { %v1844_v33 = vpack.c.bf16 %v1830_v19, %v1828_v31 }
 0x5c3   :  { %v1845_v15 = vpack.c.bf16 %v1831_v41, %v1829_v30  ;;  %v1799_v47 = vpop.f32.mrb[56].mxu1  ;;  %v1711_v41 = vpop.permute.xlu0 %1710 }
 0x5c4   :  { %v1800_v12 = vadd.f32 %v1799_v47, %v1696_v43  ;;  %v1801_v1 = vpop.f32.mrb[57].mxu1 }
 0x5c5   :  { %v1802_v34 = vadd.f32 %v1801_v1, %v1696_v43  ;;  %v1803_v49 = vpop.f32.mrb[58].mxu1  ;;  %1942 = vmatprep.subr.bf16.mxu0 %v1845_v15 }
 0x5c6   :  { %v1804_v39 = vadd.f32 %v1803_v49, %v1701_v58  ;;  %v1805_v11 = vpop.f32.mrb[59].mxu1  ;;  %1943 = vmatpush1.bf16.msra.mxu0 %v1844_v33  ;;  %v1832_v51 = vmax.f32 %v1800_v12, 0.0  ;;  %v1716_v49 = vpop.permute.xlu1 %1715 }
 0x5c7   :  { %v1806_v25 = vadd.f32 %v1805_v11, %v1701_v58  ;;  %v1833_v44 = vmax.f32 %v1802_v34, 0.0 }
 0x5c8   :  { %v1834_v45 = vmax.f32 %v1804_v39, 0.0 }
 0x5c9   :  { %v1835_v9 = vmax.f32 %v1806_v25, 0.0 }
 0x5ca   :  { %v1846_v40 = vpack.c.bf16 %v1834_v45, %v1832_v51 }
 0x5cb   :  { %v1847_v37 = vpack.c.bf16 %v1835_v9, %v1833_v44  ;;  %v1809_v31 = vpop.f32.mrb[60].mxu1  ;;  %v1721_v44 = vpop.permute.xlu0 %1720 }
 0x5cc   :  { %v1810_v19 = vadd.f32 %v1809_v31, %v1706_v17  ;;  %v1811_v30 = vpop.f32.mrb[61].mxu1 }
 0x5cd   :  { %v1812_v47 = vadd.f32 %v1811_v30, %v1706_v17  ;;  %v1813_v36 = vpop.f32.mrb[62].mxu1  ;;  %1944 = vmatprep.subr.bf16.mxu0 %v1847_v37 }
 0x5ce   :  { %v1814_v43 = vadd.f32 %v1813_v36, %v1711_v41  ;;  %v1815_v15 = vpop.f32.mrb[63].mxu1  ;;  %1945 = vmatpush1.bf16.msra.mxu0 %v1846_v40  ;;  %v1836_v33 = vmax.f32 %v1810_v19, 0.0 }
 0x5cf   :  { %v1816_v1 = vadd.f32 %v1815_v15, %v1711_v41  ;;  %v1837_v12 = vmax.f32 %v1812_v47, 0.0  ;;  %v3472_v15 = vld [vmem:[%s4971_s4 + $0xa0] sm:$0xff]  }
 0x5d0   :  { %v1838_v58 = vmax.f32 %v1814_v43, 0.0 }
 0x5d1   :  { %v1839_v39 = vmax.f32 %v1816_v1, 0.0  ;;  %v3473_v1 = vld [vmem:[%s4971_s4 + $0xa8] sm:$0xff]  }
 0x5d2   :  { %v1848_v34 = vpack.c.bf16 %v1838_v58, %v1836_v33  ;;  %v3474_v33 = vld [vmem:[%s4971_s4 + $0xb0] sm:$0xff]   ;;  %v3475_v58 = vld [vmem:[%s4971_s4 + $0xb8] sm:$0xff]  }
 0x5d3   :  { %v1849_v11 = vpack.c.bf16 %v1839_v39, %v1837_v12  ;;  %v1819_v25 = vpop.f32.mrb[64].mxu1  ;;  %v1571_v12 = vadd.f32 %v4499_v8, %v4490_v3  ;;  %v1573_v39 = vadd.f32 %v4506_v4, %v4490_v3  ;;  %v1587_v8 = vadd.f32 %v4565_v38, %v4540_v53  ;;  %v5049_v4 = vld [vmem:[#allocation23_spill] sm:$0xff] }
 0x5d4   :  { %v1820_v51 = vadd.f32 %v1819_v25, %v1716_v49  ;;  %v1821_v45 = vpop.f32.mrb[65].mxu1  ;;  %v1583_v25 = vadd.f32 %v4550_v56, %v4531_v0 }
 0x5d5   :  { %v1822_v9 = vadd.f32 %v1821_v45, %v1716_v49  ;;  %v1823_v31 = vpop.f32.mrb[66].mxu1  ;;  %1946 = vmatprep.subr.bf16.mxu0 %v1849_v11  ;;  %v1577_v49 = vadd.f32 %v4521_v18, %v4496_v22  ;;  %v1581_v11 = vadd.f32 %v4543_v10, %v4531_v0  ;;  %v5048_v45 = vld [vmem:[#allocation24_spill] sm:$0xff]  ;;  %v5053_v10 = vld [vmem:[#allocation27_spill] sm:$0xff]  ;;  %v5054_v0 = vld [vmem:[#allocation29_spill] sm:$0xff] }
 0x5d6   :  { %v1824_v17 = vadd.f32 %v1823_v31, %v1721_v44  ;;  %v1825_v37 = vpop.f32.mrb[67].mxu1  ;;  %1947 = vmatpush1.bf16.msra.mxu0 %v1848_v34  ;;  %v1840_v40 = vmax.f32 %v1820_v51, 0.0  ;;  %v1575_v34 = vadd.f32 %v4513_v6, %v4496_v22  ;;  %v1585_v51 = vadd.f32 %v4557_v50, %v4540_v53  ;;  %v5050_v6 = vld [vmem:[#allocation25_spill] sm:$0xff]  ;;  %v5051_v31 = vld [vmem:[#allocation26_spill] sm:$0xff]  ;;  %v5052_v18 = vld [vmem:[#allocation28_spill] sm:$0xff] }
 0x5d7   :  { %v1826_v36 = vadd.f32 %v1825_v37, %v1721_v44  ;;  %v1841_v19 = vmax.f32 %v1822_v9, 0.0  ;;  %v1609_v3 = vadd.f32 %v5048_v45, %v1571_v12  ;;  %v1610_v44 = vadd.f32 %v5049_v4, %v1573_v39 }
 0x5d8   :  { %v1842_v30 = vmax.f32 %v1824_v17, 0.0  ;;  %v1611_v9 = vadd.f32 %v5050_v6, %v1575_v34  ;;  %v1612_v22 = vadd.f32 %v5051_v31, %v1577_v49  ;;  %v1613_v17 = vadd.f32 %v5052_v18, %v1581_v11  ;;  %v5056_v31 = vld [vmem:[#allocation32_spill] sm:$0xff] }
 0x5d9   :  { %v1843_v41 = vmax.f32 %v1826_v36, 0.0  ;;  %v1614_v37 = vadd.f32 %v5053_v10, %v1583_v25  ;;  %v1873_v36 = vpop.permute.xlu1 %1872  ;;  %v1615_v56 = vadd.f32 %v5054_v0, %v1585_v51  ;;  %v1626_v53 = vadd.f32 nan, %v1610_v44 }
 0x5da   :  { %v1850_v47 = vpack.c.bf16 %v1842_v30, %v1840_v40  ;;  %v5055_v40 = vld [vmem:[#allocation30_spill] sm:$0xff]  ;;  %v1878_v30 = vpop.permute.xlu0 %1877  ;;  %v1627_v38 = vadd.f32 nan, %v1611_v9  ;;  %v1593_v12 = vadd.f32 %v4594_v26, %v4575_v5 }
 0x5db   :  { %v1851_v43 = vpack.c.bf16 %v1843_v41, %v1841_v19  ;;  %v1616_v50 = vadd.f32 %v5055_v40, %v1587_v8  ;;  %v1625_v19 = vadd.f32 nan, %v1609_v3  ;;  %v1628_v41 = vadd.f32 nan, %v1612_v22 }
 0x5dc   :  { %v3276_v34 = vadd.f32 %v1873_v36, %v1626_v53  ;;  %v3278_v25 = vadd.f32 %v1878_v30, %v1627_v38 }
 0x5dd   :  { %1948 = vmatprep.subr.bf16.mxu0 %v1851_v43  ;;  %v1630_v43 = vadd.f32 nan, %v1614_v37  ;;  %v3274_v39 = vadd.f32 %v1873_v36, %v1625_v19  ;;  %v3280_v51 = vadd.f32 %v1878_v30, %v1628_v41 }
 0x5de   :  { %1949 = vmatpush1.bf16.msra.mxu0 %v1850_v47  ;;  %v1629_v47 = vadd.f32 nan, %v1613_v17  ;;  %v1888_v49 = vpop.permute.xlu0 %1887  ;;  %v5057_v17 = vld [vmem:[#allocation31_spill] sm:$0xff] }
 0x5df   :  { %v1618_v10 = vadd.f32 %v5057_v17, %v1593_v12 }
 0x5e1   :  { %3106 = vmatmul.mubr.msk.bf16.vlgmr.msra.gmra.mrb[48].mxu0 %vm930_vm3, %v3472_v15  ;;  %v1631_v15 = vadd.f32 nan, %v1615_v56 }
 0x5e2   :  { %1984 = vmatprep.mubr.bf16.mxu0 %v5037_v29 }
 0x5e3   :  { %v3286_v6 = vadd.f32 %v1888_v49, %v1631_v15 }
 0x5e9   :  { %3107 = vmatmul.mubr.msk.bf16.gmra.mrb[52].mxu0 %vm930_vm3, %v3473_v1  ;;  %v1632_v1 = vadd.f32 nan, %v1616_v50  ;;  %v1597_v50 = vadd.f32 %v4607_v62, %v4584_v27 }
 0x5ea   :  { %1994 = vmatprep.mubr.bf16.mxu0 %v5037_v29 }
 0x5eb   :  { %v3288_v9 = vadd.f32 %v1888_v49, %v1632_v1 }
 0x5f1   :  { %3108 = vmatmul.mubr.msk.bf16.gmra.mrb[56].mxu0 %vm930_vm3, %v3474_v33  ;;  %v1591_v33 = vadd.f32 %v4587_v55, %v4575_v5  ;;  %v1595_v55 = vadd.f32 %v4601_v2, %v4584_v27 }
 0x5f2   :  { %2004 = vmatprep.mubr.bf16.mxu0 %v5037_v29 }
 0x5f3   :  { %v1617_v22 = vadd.f32 %v5056_v31, %v1591_v33  ;;  %v5058_v33 = vld [vmem:[#allocation33_spill] sm:$0xff] }
 0x5f4   :  { %v1619_v12 = vadd.f32 %v5058_v33, %v1595_v55  ;;  %v1634_v55 = vadd.f32 nan, %v1618_v10 }
 0x5f9   :  { %3109 = vmatmul.mubr.msk.bf16.gmra.mrb[60].mxu0 %vm930_vm3, %v3475_v58  ;;  %v1883_v58 = vpop.permute.xlu1 %1882 }
 0x5fa   :  { %2380 = vmatprep.mubr.bf16.mxu0 %v5037_v29  ;;  %v3282_v8 = vadd.f32 %v1883_v58, %v1629_v47  ;;  %v3284_v45 = vadd.f32 %v1883_v58, %v1630_v43 }
 0x6b4   :  { %v1976_v11 = vpop.f32.mrb[48].mxu0 }
 0x6b5   :  { %v1977_v3 = vadd.f32 %v1976_v11, %v1873_v36  ;;  %v3275_v4 = vadd.f32 %v3274_v39, %v1976_v11  ;;  %v1978_v44 = vpop.f32.mrb[49].mxu0  ;;  %v5059_v11 = vld [vmem:[#allocation7_spill] sm:$0xff] }
 0x6b6   :  { %v1979_v18 = vadd.f32 %v1978_v44, %v1873_v36  ;;  %v3277_v5 = vadd.f32 %v3276_v34, %v1978_v44  ;;  %v1980_v26 = vpop.f32.mrb[50].mxu0 }
 0x6b7   :  { %v2015_v37 = vadd.f32 %v4504_v42, %v1977_v3  ;;  %v1981_v0 = vadd.f32 %v1980_v26, %v1878_v30  ;;  %v3279_v56 = vadd.f32 %v3278_v25, %v1980_v26  ;;  %v1982_v40 = vpop.f32.mrb[51].mxu0  ;;  %v2047_v47 = vmax.f32 %v3275_v4, 0.0  ;;  %v5061_v3 = vld [vmem:[#allocation8_spill] sm:$0xff] }
 0x6b8   :  { %v2016_v19 = vadd.f32 %v4511_v24, %v1979_v18  ;;  %v1983_v53 = vadd.f32 %v1982_v40, %v1878_v30  ;;  %v3281_v38 = vadd.f32 %v3280_v51, %v1982_v40  ;;  %v2048_v15 = vmax.f32 %v3277_v5, 0.0  ;;  %v5060_v24 = vld [vmem:[#allocation34_spill] sm:$0xff]  ;;  %v5062_v18 = vld [vmem:[#allocation9_spill] sm:$0xff] }
 0x6b9   :  { %v2031_v41 = vadd.f32 nan, %v2015_v37  ;;  %v2017_v2 = vadd.f32 %v4519_v54, %v1981_v0  ;;  %v2049_v36 = vmax.f32 %v3279_v56, 0.0  ;;  %v1620_v62 = vadd.f32 %v5060_v24, %v1597_v50  ;;  %v5063_v0 = vld [vmem:[#allocation10_spill] sm:$0xff]  ;;  %v5065_v24 = vld [vmem:[#allocation12_spill] sm:$0xff] }
 0x6ba   :  { %v2032_v43 = vadd.f32 nan, %v2016_v19  ;;  %v2018_v1 = vadd.f32 %v4526_v48, %v1983_v53  ;;  %v2050_v42 = vmax.f32 %v3281_v38, 0.0  ;;  %v1633_v4 = vadd.f32 nan, %v1617_v22 }
 0x6bb   :  { %v2033_v39 = vadd.f32 nan, %v2017_v2  ;;  %v2063_v34 = vpack.c.bf16 %v2049_v36, %v2047_v47  ;;  %v4724_v27 = vadd.f32 %v2031_v41, %v5059_v11  ;;  %v1635_v40 = vadd.f32 nan, %v1619_v12  ;;  %v1893_v36 = vpop.permute.xlu1 %1892  ;;  %v5064_v12 = vld [vmem:[#allocation11_spill] sm:$0xff] }
 0x6bc   :  { %v2034_v30 = vadd.f32 nan, %v2018_v1  ;;  %v1986_v25 = vpop.f32.mrb[52].mxu0  ;;  %v2064_v51 = vpack.c.bf16 %v2050_v42, %v2048_v15  ;;  %v4728_v54 = vadd.f32 %v2032_v43, %v5061_v3  ;;  %v3290_v33 = vadd.f32 %v1893_v36, %v1633_v4 }
 0x6bd   :  { %v1987_v44 = vadd.f32 %v1986_v25, %v1883_v58  ;;  %v3283_v31 = vadd.f32 %v3282_v8, %v1986_v25  ;;  %v1988_v48 = vpop.f32.mrb[53].mxu0  ;;  %v4731_v5 = vadd.f32 %v2033_v39, %v5062_v18  ;;  %v1636_v8 = vadd.f32 nan, %v1620_v62  ;;  %v5067_v18 = vld [vmem:[#allocation14_spill] sm:$0xff] }
 0x6be   :  { %v1989_v26 = vadd.f32 %v1988_v48, %v1883_v58  ;;  %v3285_v17 = vadd.f32 %v3284_v45, %v1988_v48  ;;  %v1990_v37 = vpop.f32.mrb[54].mxu0  ;;  %2161 = vmatprep.subr.bf16.mxu1 %v2064_v51  ;;  %v4734_v56 = vadd.f32 %v2034_v30, %v5063_v0 }
 0x6bf   :  { %v2019_v50 = vadd.f32 %v4548_v32, %v1987_v44  ;;  %v1991_v19 = vadd.f32 %v1990_v37, %v1888_v49  ;;  %v3287_v53 = vadd.f32 %v3286_v6, %v1990_v37  ;;  %v1992_v22 = vpop.f32.mrb[55].mxu0  ;;  %2162 = vmatpush1.bf16.msra.mxu1 %v2063_v34  ;;  %v2051_v58 = vmax.f32 %v3283_v31, 0.0 }
 0x6c0   :  { %v2020_v38 = vadd.f32 %v4555_v13, %v1989_v26  ;;  %v1993_v41 = vadd.f32 %v1992_v22, %v1888_v49  ;;  %v3289_v47 = vadd.f32 %v3288_v9, %v1992_v22  ;;  %v2052_v15 = vmax.f32 %v3285_v17, 0.0  ;;  %v1898_v13 = vpop.permute.xlu0 %1897 }
 0x6c1   :  { %v2035_v10 = vadd.f32 nan, %v2019_v50  ;;  %v2021_v45 = vadd.f32 %v4563_v46, %v1991_v19  ;;  %v2053_v2 = vmax.f32 %v3287_v53, 0.0  ;;  %v3292_v34 = vadd.f32 %v1893_v36, %v1634_v55 }
 0x6c2   :  { %v2036_v43 = vadd.f32 nan, %v2020_v38  ;;  %v2022_v1 = vadd.f32 %v4570_v60, %v1993_v41  ;;  %v2054_v32 = vmax.f32 %v3289_v47, 0.0  ;;  %v3294_v51 = vadd.f32 %v1898_v13, %v1635_v40  ;;  %v5066_v60 = vld [vmem:[#allocation13_spill] sm:$0xff]  ;;  %v1903_v47 = vpop.permute.xlu1 %1902 }
 0x6c3   :  { %v2037_v42 = vadd.f32 nan, %v2021_v45  ;;  %v2065_v6 = vpack.c.bf16 %v2053_v2, %v2051_v58  ;;  %v4741_v39 = vadd.f32 %v2035_v10, %v5064_v12  ;;  %v3296_v48 = vadd.f32 %v1898_v13, %v1636_v8 }
 0x6c4   :  { %v2038_v49 = vadd.f32 nan, %v2022_v1  ;;  %v1996_v9 = vpop.f32.mrb[56].mxu0  ;;  %v2066_v11 = vpack.c.bf16 %v2054_v32, %v2052_v15  ;;  %v4744_v46 = vadd.f32 %v2036_v43, %v5065_v24  ;;  %v5068_v43 = vld [vmem:[#allocation15_spill] sm:$0xff] }
 0x6c5   :  { %v1997_v62 = vadd.f32 %v1996_v9, %v1893_v36  ;;  %v3291_v30 = vadd.f32 %v3290_v33, %v1996_v9  ;;  %v1998_v25 = vpop.f32.mrb[57].mxu0  ;;  %v4747_v3 = vadd.f32 %v2037_v42, %v5066_v60  ;;  %v3302_v42 = vadd.f32 %v4636_v7, %v1903_v47  ;;  %v5070_v9 = vld [vmem:[#allocation17_spill] sm:$0xff] }
 0x6c6   :  { %v1999_v44 = vadd.f32 %v1998_v25, %v1893_v36  ;;  %v3293_v4 = vadd.f32 %v3292_v34, %v1998_v25  ;;  %v2000_v31 = vpop.f32.mrb[58].mxu0  ;;  %2163 = vmatprep.subr.bf16.mxu1 %v2066_v11  ;;  %v4750_v26 = vadd.f32 %v2038_v49, %v5067_v18  ;;  %v3299_v36 = vadd.f32 %v4633_v59, %v1903_v47 }
 0x6c7   :  { %v2023_v55 = vadd.f32 %v4592_v14, %v1997_v62  ;;  %v2001_v17 = vadd.f32 %v2000_v31, %v1898_v13  ;;  %v3295_v37 = vadd.f32 %v3294_v51, %v2000_v31  ;;  %v2002_v0 = vpop.f32.mrb[59].mxu0  ;;  %2164 = vmatpush1.bf16.msra.mxu1 %v2065_v6  ;;  %v2055_v22 = vmax.f32 %v3291_v30, 0.0  ;;  %v5069_v6 = vld [vmem:[#allocation16_spill] sm:$0xff]  ;;  %v5071_v30 = vld [vmem:[#allocation18_spill] sm:$0xff] }
 0x6c8   :  { %v2024_v50 = vadd.f32 %v4599_v20, %v1999_v44  ;;  %v2003_v40 = vadd.f32 %v2002_v0, %v1898_v13  ;;  %v3297_v19 = vadd.f32 %v3296_v48, %v2002_v0  ;;  %v2056_v10 = vmax.f32 %v3293_v4, 0.0  ;;  %v1908_v20 = vpop.permute.xlu0 %1907  ;;  %v5072_v0 = vld [vmem:[#allocation2_spill] sm:$0xff] }
 0x6c9   :  { %v2039_v53 = vadd.f32 nan, %v2023_v55  ;;  %v2025_v38 = vadd.f32 %v4605_v52, %v2001_v17  ;;  %v2057_v41 = vmax.f32 %v3295_v37, 0.0  ;;  %v3305_v49 = vadd.f32 %v4639_v35, %v1908_v20 }
 0x6ca   :  { %v2040_v8 = vadd.f32 nan, %v2024_v50  ;;  %v2026_v58 = vadd.f32 %v4610_v23, %v2003_v40  ;;  %v2058_v45 = vmax.f32 %v3297_v19, 0.0  ;;  %v3308_v62 = vadd.f32 %v4645_v16, %v1908_v20  ;;  %v5073_v40 = vld [vmem:[#allocation5_spill] sm:$0xff] }
 0x6cb   :  { %v2041_v14 = vadd.f32 nan, %v2025_v38  ;;  %v2067_v2 = vpack.c.bf16 %v2057_v41, %v2055_v22  ;;  %v4758_v15 = vadd.f32 %v2039_v53, %v5068_v43  ;;  %v5074_v22 = vld [vmem:[#allocation19_spill] sm:$0xff]  ;;  %v2092_v43 = vpop.permute.xlu1 %2091 }
 0x6cc   :  { %v2042_v1 = vadd.f32 nan, %v2026_v58  ;;  %v2006_v32 = vpop.f32.mrb[60].mxu0  ;;  %v2068_v52 = vpack.c.bf16 %v2058_v45, %v2056_v10  ;;  %v4762_v33 = vadd.f32 %v2040_v8, %v5069_v6  ;;  %v5078_v58 = vld [vmem:[#allocation22_spill] sm:$0xff] }
 0x6cd   :  { %v2007_v12 = vadd.f32 %v2006_v32, %v1903_v47  ;;  %v3300_v13 = vadd.f32 %v3299_v36, %v2006_v32  ;;  %v2008_v23 = vpop.f32.mrb[61].mxu0  ;;  %v4766_v34 = vadd.f32 %v2041_v14, %v5070_v9  ;;  %v3477_v14 = vld [vmem:[%s4971_s4 + $0xc8] sm:$0xff]   ;;  %v3479_v36 = vld [vmem:[%s4971_s4 + $0xd8] sm:$0xff]  }
 0x6ce   :  { %v2009_v59 = vadd.f32 %v2008_v23, %v1903_v47  ;;  %v3303_v11 = vadd.f32 %v3302_v42, %v2008_v23  ;;  %v2010_v24 = vpop.f32.mrb[62].mxu0  ;;  %2165 = vmatprep.subr.bf16.mxu1 %v2068_v52  ;;  %v4770_v7 = vadd.f32 %v2042_v1, %v5071_v30  ;;  %v2097_v42 = vpop.permute.xlu0 %2096 }
 0x6cf   :  { %v2027_v25 = vadd.f32 %v4616_v28, %v2007_v12  ;;  %v2011_v51 = vadd.f32 %v2010_v24, %v1908_v20  ;;  %v3306_v60 = vadd.f32 %v3305_v49, %v2010_v24  ;;  %v2012_v44 = vpop.f32.mrb[63].mxu0  ;;  %2166 = vmatpush1.bf16.msra.mxu1 %v2067_v2  ;;  %v2059_v18 = vmax.f32 %v3300_v13, 0.0  ;;  %v3478_v2 = vld [vmem:[%s4971_s4 + $0xd0] sm:$0xff]  }
 0x6d0   :  { %v2028_v35 = vadd.f32 %v4618_v57, %v2009_v59  ;;  %v2013_v4 = vadd.f32 %v2012_v44, %v1908_v20  ;;  %v3309_v31 = vadd.f32 %v3308_v62, %v2012_v44  ;;  %v2060_v37 = vmax.f32 %v3303_v11, 0.0  ;;  %v5075_v57 = vld [vmem:[#allocation6_spill] sm:$0xff]  ;;  %v2102_v62 = vpop.permute.xlu1 %2101 }
 0x6d1   :  { %v2043_v48 = vadd.f32 %v2027_v25, %v5044_v21  ;;  %v2029_v55 = vadd.f32 %v4621_v63, %v2011_v51  ;;  %v2061_v17 = vmax.f32 %v3306_v60, 0.0  ;;  %v5076_v21 = vld [vmem:[#allocation20_spill] sm:$0xff]  ;;  %v5077_v63 = vld [vmem:[#allocation21_spill] sm:$0xff] }
 0x6d2   :  { %v2044_v16 = vadd.f32 %v2028_v35, %v5045_v61  ;;  %v2030_v50 = vadd.f32 %v5072_v0, %v2013_v4  ;;  %v2062_v28 = vmax.f32 %v3309_v31, 0.0  ;;  %v3476_v61 = vld [vmem:[%s4971_s4 + $0xc0] sm:$0xff]   ;;  %v2107_v44 = vpop.permute.xlu0 %2106 }
 0x6d3   :  { %v2045_v19 = vadd.f32 %v2029_v55, %v5073_v40  ;;  %v2069_v53 = vpack.c.bf16 %v2061_v17, %v2059_v18  ;;  %v4780_v38 = vadd.f32 %v2043_v48, %v5074_v22 }
 0x6d4   :  { %v2046_v41 = vadd.f32 %v2030_v50, %v5075_v57  ;;  %v2070_v47 = vpack.c.bf16 %v2062_v28, %v2060_v37  ;;  %v4784_v8 = vadd.f32 %v2044_v16, %v5076_v21  ;;  %v2112_v50 = vpop.permute.xlu1 %2111 }
 0x6d5   :  { %v4787_v10 = vadd.f32 %v2045_v19, %v5077_v63 }
 0x6d6   :  { %2167 = vmatprep.subr.bf16.mxu1 %v2070_v47  ;;  %v4793_v45 = vadd.f32 %v2046_v41, %v5078_v58  ;;  %v2117_v22 = vpop.permute.xlu0 %2116 }
 0x6d7   :  { %2168 = vmatpush1.bf16.msra.mxu1 %v2069_v53 }
 0x6da   :  { %3130 = vmatmul.mubr.msk.bf16.vlgmr.msra.gmra.mrb[68].mxu1 %vm930_vm3, %v3476_v61 }
 0x6db   :  { %2203 = vmatprep.mubr.bf16.mxu1 %v5037_v29 }
 0x6e2   :  { %3131 = vmatmul.mubr.msk.bf16.gmra.mrb[72].mxu1 %vm930_vm3, %v3477_v14 }
 0x6e3   :  { %2213 = vmatprep.mubr.bf16.mxu1 %v5037_v29 }
 0x6ea   :  { %3132 = vmatmul.mubr.msk.bf16.gmra.mrb[76].mxu1 %vm930_vm3, %v3478_v2 }
 0x6eb   :  { %2223 = vmatprep.mubr.bf16.mxu1 %v5037_v29 }
 0x6f2   :  { %3133 = vmatmul.mubr.msk.bf16.gmra.mrb[80].mxu1 %vm930_vm3, %v3479_v36 }
 0x6f3   :  { %2599 = vmatprep.mubr.bf16.mxu1 %v5037_v29 }
 0x7ad   :  { %v2195_v20 = vpop.f32.mrb[68].mxu1 }
 0x7ae   :  { %v2196_v1 = vadd.f32 %v2195_v20, %v2092_v43  ;;  %v2197_v32 = vpop.f32.mrb[69].mxu1 }
 0x7af   :  { %v2198_v52 = vadd.f32 %v2197_v32, %v2092_v43  ;;  %v2199_v6 = vpop.f32.mrb[70].mxu1  ;;  %v2122_v43 = vpop.permute.xlu1 %2121 }
 0x7b0   :  { %v2200_v12 = vadd.f32 %v2199_v6, %v2097_v42  ;;  %v2201_v13 = vpop.f32.mrb[71].mxu1  ;;  %v2234_v49 = vmax.f32 %v2196_v1, 0.0 }
 0x7b1   :  { %v2202_v23 = vadd.f32 %v2201_v13, %v2097_v42  ;;  %v2235_v59 = vmax.f32 %v2198_v52, 0.0  ;;  %v2127_v52 = vpop.permute.xlu0 %2126 }
 0x7b2   :  { %v2236_v9 = vmax.f32 %v2200_v12, 0.0 }
 0x7b3   :  { %v2237_v11 = vmax.f32 %v2202_v23, 0.0 }
 0x7b4   :  { %v2250_v24 = vpack.c.bf16 %v2236_v9, %v2234_v49 }
 0x7b5   :  { %v2251_v30 = vpack.c.bf16 %v2237_v11, %v2235_v59  ;;  %v2205_v25 = vpop.f32.mrb[72].mxu1 }
 0x7b6   :  { %v2206_v51 = vadd.f32 %v2205_v25, %v2102_v62  ;;  %v2207_v60 = vpop.f32.mrb[73].mxu1  ;;  %v3480_v25 = vld [vmem:[%s4971_s4 + $0xe0] sm:$0xff]  }
 0x7b7   :  { %v2208_v35 = vadd.f32 %v2207_v60, %v2102_v62  ;;  %v2209_v4 = vpop.f32.mrb[74].mxu1  ;;  %2348 = vmatprep.subr.bf16.mxu0 %v2251_v30  ;;  %v3482_v60 = vld [vmem:[%s4971_s4 + $0xf0] sm:$0xff]  }
 0x7b8   :  { %v2210_v31 = vadd.f32 %v2209_v4, %v2107_v44  ;;  %v2211_v48 = vpop.f32.mrb[75].mxu1  ;;  %2349 = vmatpush1.bf16.msra.mxu0 %v2250_v24  ;;  %v2238_v55 = vmax.f32 %v2206_v51, 0.0  ;;  %v3481_v51 = vld [vmem:[%s4971_s4 + $0xe8] sm:$0xff]  }
 0x7b9   :  { %v2212_v18 = vadd.f32 %v2211_v48, %v2107_v44  ;;  %v2239_v16 = vmax.f32 %v2208_v35, 0.0  ;;  %v3483_v44 = vld [vmem:[%s4971_s4 + $0xf8] sm:$0xff]   ;;  %v2279_v35 = vpop.permute.xlu1 %2278 }
 0x7ba   :  { %v2240_v17 = vmax.f32 %v2210_v31, 0.0  ;;  %v3311_v4 = vadd.f32 %v4724_v27, %v2279_v35  ;;  %v2284_v31 = vpop.permute.xlu0 %2283 }
 0x7bb   :  { %v2241_v37 = vmax.f32 %v2212_v18, 0.0  ;;  %v3314_v18 = vadd.f32 %v4728_v54, %v2279_v35 }
 0x7bc   :  { %v2252_v0 = vpack.c.bf16 %v2240_v17, %v2238_v55 }
 0x7bd   :  { %v2253_v28 = vpack.c.bf16 %v2241_v37, %v2239_v16  ;;  %v2215_v40 = vpop.f32.mrb[76].mxu1  ;;  %v3317_v16 = vadd.f32 %v4731_v5, %v2284_v31 }
 0x7be   :  { %v2216_v19 = vadd.f32 %v2215_v40, %v2112_v50  ;;  %v2217_v53 = vpop.f32.mrb[77].mxu1 }
 0x7bf   :  { %v2218_v57 = vadd.f32 %v2217_v53, %v2112_v50  ;;  %v2219_v41 = vpop.f32.mrb[78].mxu1  ;;  %2350 = vmatprep.subr.bf16.mxu0 %v2253_v28  ;;  %v3320_v50 = vadd.f32 %v4734_v56, %v2284_v31  ;;  %v2289_v53 = vpop.permute.xlu1 %2288 }
 0x7c0   :  { %v2220_v47 = vadd.f32 %v2219_v41, %v2117_v22  ;;  %v2221_v21 = vpop.f32.mrb[79].mxu1  ;;  %2351 = vmatpush1.bf16.msra.mxu0 %v2252_v0  ;;  %v2242_v61 = vmax.f32 %v2216_v19, 0.0  ;;  %v3323_v5 = vadd.f32 %v4741_v39, %v2289_v53  ;;  %v2294_v41 = vpop.permute.xlu0 %2293  ;;  %v3326_v56 = vadd.f32 %v4744_v46, %v2289_v53 }
 0x7c1   :  { %v2222_v63 = vadd.f32 %v2221_v21, %v2117_v22  ;;  %v2243_v14 = vmax.f32 %v2218_v57, 0.0 }
 0x7c2   :  { %v2244_v58 = vmax.f32 %v2220_v47, 0.0 }
 0x7c3   :  { %v2245_v2 = vmax.f32 %v2222_v63, 0.0 }
 0x7c4   :  { %v2254_v36 = vpack.c.bf16 %v2244_v58, %v2242_v61 }
 0x7c5   :  { %v2255_v20 = vpack.c.bf16 %v2245_v2, %v2243_v14  ;;  %v2225_v1 = vpop.f32.mrb[80].mxu1  ;;  %v3329_v14 = vadd.f32 %v4747_v3, %v2294_v41 }
 0x7c6   :  { %v2226_v32 = vadd.f32 %v2225_v1, %v2122_v43  ;;  %v2227_v42 = vpop.f32.mrb[81].mxu1 }
 0x7c7   :  { %v2228_v6 = vadd.f32 %v2227_v42, %v2122_v43  ;;  %v2229_v12 = vpop.f32.mrb[82].mxu1  ;;  %2352 = vmatprep.subr.bf16.mxu0 %v2255_v20  ;;  %v3332_v43 = vadd.f32 %v4750_v26, %v2294_v41 }
 0x7c8   :  { %v2230_v13 = vadd.f32 %v2229_v12, %v2127_v52  ;;  %v2231_v23 = vpop.f32.mrb[83].mxu1  ;;  %2353 = vmatpush1.bf16.msra.mxu0 %v2254_v36  ;;  %v2246_v9 = vmax.f32 %v2226_v32, 0.0  ;;  %v2299_v32 = vpop.permute.xlu1 %2298 }
 0x7c9   :  { %v2232_v49 = vadd.f32 %v2231_v23, %v2127_v52  ;;  %v2247_v11 = vmax.f32 %v2228_v6, 0.0  ;;  %v3335_v6 = vadd.f32 %v4758_v15, %v2299_v32  ;;  %v2304_v12 = vpop.permute.xlu0 %2303  ;;  %v3338_v26 = vadd.f32 %v4762_v33, %v2299_v32 }
 0x7ca   :  { %v2248_v59 = vmax.f32 %v2230_v13, 0.0 }
 0x7cb   :  { %v2249_v24 = vmax.f32 %v2232_v49, 0.0 }
 0x7cc   :  { %v2256_v62 = vpack.c.bf16 %v2248_v59, %v2246_v9 }
 0x7cd   :  { %v2257_v30 = vpack.c.bf16 %v2249_v24, %v2247_v11  ;;  %v3341_v11 = vadd.f32 %v4766_v34, %v2304_v12  ;;  %v2314_v31 = vpop.permute.xlu0 %2313 }
 0x7ce   :  { %v3356_v53 = vadd.f32 %v4793_v45, %v2314_v31  ;;  %v3484_v45 = vld [vmem:[%s4971_s4 + $0x100] sm:$0xff]  }
 0x7cf   :  { %2354 = vmatprep.subr.bf16.mxu0 %v2257_v30  ;;  %v3344_v30 = vadd.f32 %v4770_v7, %v2304_v12 }
 0x7d0   :  { %2355 = vmatpush1.bf16.msra.mxu0 %v2256_v62 }
 0x7d3   :  { %3154 = vmatmul.mubr.msk.bf16.vlgmr.msra.gmra.mrb[64].mxu0 %vm930_vm3, %v3480_v25 }
 0x7d4   :  { %2390 = vmatprep.mubr.bf16.mxu0 %v5037_v29 }
 0x7db   :  { %3155 = vmatmul.mubr.msk.bf16.gmra.mrb[68].mxu0 %vm930_vm3, %v3481_v51 }
 0x7dc   :  { %2400 = vmatprep.mubr.bf16.mxu0 %v5037_v29 }
 0x7e3   :  { %3156 = vmatmul.mubr.msk.bf16.gmra.mrb[72].mxu0 %vm930_vm3, %v3482_v60  ;;  %v2309_v60 = vpop.permute.xlu1 %2308 }
 0x7e4   :  { %2410 = vmatprep.mubr.bf16.mxu0 %v5037_v29  ;;  %v3350_v7 = vadd.f32 %v4784_v8, %v2309_v60 }
 0x7eb   :  { %3157 = vmatmul.mubr.msk.bf16.gmra.mrb[76].mxu0 %vm930_vm3, %v3483_v44 }
 0x8a6   :  { %v2382_v48 = vpop.f32.mrb[64].mxu0 }
 0x8a7   :  { %v4833_v55 = vadd.f32 %v3311_v4, %v2382_v48  ;;  %v2384_v17 = vpop.f32.mrb[65].mxu0  ;;  %v3347_v4 = vadd.f32 %v4780_v38, %v2309_v60 }
 0x8a8   :  { %v4836_v37 = vadd.f32 %v3314_v18, %v2384_v17  ;;  %v2386_v0 = vpop.f32.mrb[66].mxu0 }
 0x8a9   :  { %v4839_v28 = vadd.f32 %v3317_v16, %v2386_v0  ;;  %v2388_v40 = vpop.f32.mrb[67].mxu0  ;;  %v2453_v57 = vmax.f32 %v4833_v55, 0.0 }
 0x8aa   :  { %v4841_v19 = vadd.f32 %v3320_v50, %v2388_v40  ;;  %v2454_v54 = vmax.f32 %v4836_v37, 0.0  ;;  %v3353_v50 = vadd.f32 %v4787_v10, %v2314_v31 }
 0x8ab   :  { %v2455_v27 = vmax.f32 %v4839_v28, 0.0 }
 0x8ac   :  { %v2456_v22 = vmax.f32 %v4841_v19, 0.0 }
 0x8ad   :  { %v2469_v63 = vpack.c.bf16 %v2455_v27, %v2453_v57 }
 0x8ae   :  { %v2392_v47 = vpop.f32.mrb[68].mxu0  ;;  %v2470_v21 = vpack.c.bf16 %v2456_v22, %v2454_v54 }
 0x8af   :  { %v4849_v61 = vadd.f32 %v3323_v5, %v2392_v47  ;;  %v2394_v58 = vpop.f32.mrb[69].mxu0 }
 0x8b0   :  { %v4852_v2 = vadd.f32 %v3326_v56, %v2394_v58  ;;  %v2396_v36 = vpop.f32.mrb[70].mxu0  ;;  %2567 = vmatprep.subr.bf16.mxu1 %v2470_v21  ;;  %v3485_v56 = vld [vmem:[%s4971_s4 + $0x108] sm:$0xff]   ;;  %v3486_v21 = vld [vmem:[%s4971_s4 + $0x110] sm:$0xff]   ;;  %v2498_v58 = vpop.permute.xlu1 %2497 }
 0x8b1   :  { %v4855_v20 = vadd.f32 %v3329_v14, %v2396_v36  ;;  %v2398_v39 = vpop.f32.mrb[71].mxu0  ;;  %2568 = vmatpush1.bf16.msra.mxu1 %v2469_v63  ;;  %v2457_v3 = vmax.f32 %v4849_v61, 0.0  ;;  %v3487_v63 = vld [vmem:[%s4971_s4 + $0x118] sm:$0xff]  }
 0x8b2   :  { %v4857_v1 = vadd.f32 %v3332_v43, %v2398_v39  ;;  %v2458_v42 = vmax.f32 %v4852_v2, 0.0  ;;  %v2503_v39 = vpop.permute.xlu0 %2502 }
 0x8b3   :  { %v2459_v46 = vmax.f32 %v4855_v20, 0.0 }
 0x8b4   :  { %v2460_v52 = vmax.f32 %v4857_v1, 0.0 }
 0x8b5   :  { %v2471_v49 = vpack.c.bf16 %v2459_v46, %v2457_v3 }
 0x8b6   :  { %v2402_v13 = vpop.f32.mrb[72].mxu0  ;;  %v2472_v23 = vpack.c.bf16 %v2460_v52, %v2458_v42 }
 0x8b7   :  { %v4865_v9 = vadd.f32 %v3335_v6, %v2402_v13  ;;  %v2404_v59 = vpop.f32.mrb[73].mxu0 }
 0x8b8   :  { %v4868_v24 = vadd.f32 %v3338_v26, %v2404_v59  ;;  %v2406_v62 = vpop.f32.mrb[74].mxu0  ;;  %2569 = vmatprep.subr.bf16.mxu1 %v2472_v23 }
 0x8b9   :  { %v4871_v25 = vadd.f32 %v3341_v11, %v2406_v62  ;;  %v2408_v15 = vpop.f32.mrb[75].mxu0  ;;  %2570 = vmatpush1.bf16.msra.mxu1 %v2471_v49  ;;  %v2461_v34 = vmax.f32 %v4865_v9, 0.0  ;;  %v2508_v49 = vpop.permute.xlu1 %2507 }
 0x8ba   :  { %v4873_v51 = vadd.f32 %v3344_v30, %v2408_v15  ;;  %v2462_v44 = vmax.f32 %v4868_v24, 0.0  ;;  %v2513_v15 = vpop.permute.xlu0 %2512 }
 0x8bb   :  { %v2463_v33 = vmax.f32 %v4871_v25, 0.0 }
 0x8bc   :  { %v2464_v35 = vmax.f32 %v4873_v51, 0.0 }
 0x8bd   :  { %v2473_v17 = vpack.c.bf16 %v2463_v33, %v2461_v34 }
 0x8be   :  { %v2412_v48 = vpop.f32.mrb[76].mxu0  ;;  %v2474_v18 = vpack.c.bf16 %v2464_v35, %v2462_v44 }
 0x8bf   :  { %v4881_v16 = vadd.f32 %v3347_v4, %v2412_v48  ;;  %v2414_v0 = vpop.f32.mrb[77].mxu0 }
 0x8c0   :  { %v4884_v40 = vadd.f32 %v3350_v7, %v2414_v0  ;;  %v2416_v27 = vpop.f32.mrb[78].mxu0  ;;  %2571 = vmatprep.subr.bf16.mxu1 %v2474_v18 }
 0x8c1   :  { %v4887_v54 = vadd.f32 %v3353_v50, %v2416_v27  ;;  %v2418_v38 = vpop.f32.mrb[79].mxu0  ;;  %2572 = vmatpush1.bf16.msra.mxu1 %v2473_v17  ;;  %v2465_v10 = vmax.f32 %v4881_v16, 0.0  ;;  %v2518_v17 = vpop.permute.xlu1 %2517 }
 0x8c2   :  { %v4889_v22 = vadd.f32 %v3356_v53, %v2418_v38  ;;  %v2466_v57 = vmax.f32 %v4884_v40, 0.0  ;;  %v2523_v38 = vpop.permute.xlu0 %2522 }
 0x8c3   :  { %v2467_v8 = vmax.f32 %v4887_v54, 0.0 }
 0x8c4   :  { %v2468_v5 = vmax.f32 %v4889_v22, 0.0 }
 0x8c5   :  { %v2475_v47 = vpack.c.bf16 %v2467_v8, %v2465_v10 }
 0x8c6   :  { %v2476_v41 = vpack.c.bf16 %v2468_v5, %v2466_v57 }
 0x8c8   :  { %2573 = vmatprep.subr.bf16.mxu1 %v2476_v41 }
 0x8c9   :  { %2574 = vmatpush1.bf16.msra.mxu1 %v2475_v47 }
 0x8cc   :  { %3178 = vmatmul.mubr.msk.bf16.vlgmr.msra.gmra.mrb[84].mxu1 %vm930_vm3, %v3484_v45 }
 0x8cd   :  { %2609 = vmatprep.mubr.bf16.mxu1 %v5037_v29 }
 0x8d4   :  { %3179 = vmatmul.mubr.msk.bf16.gmra.mrb[88].mxu1 %vm930_vm3, %v3485_v56 }
 0x8d5   :  { %2619 = vmatprep.mubr.bf16.mxu1 %v5037_v29 }
 0x8dc   :  { %3180 = vmatmul.mubr.msk.bf16.gmra.mrb[92].mxu1 %vm930_vm3, %v3486_v21 }
 0x8dd   :  { %2629 = vmatprep.mubr.bf16.mxu1 %v5037_v29 }
 0x8e4   :  { %3181 = vmatmul.mubr.msk.bf16.gmra.mrb[96].mxu1 %vm930_vm3, %v3487_v63 }
 0x8e5   :  { %2786 = vmatprep.mubr.bf16.mxu1 %v5037_v29 }
 0x99f   :  { %v2601_v14 = vpop.f32.mrb[84].mxu1 }
 0x9a0   :  { %v2602_v36 = vadd.f32 %v2601_v14, %v2498_v58  ;;  %v2603_v43 = vpop.f32.mrb[85].mxu1 }
 0x9a1   :  { %v2604_v46 = vadd.f32 %v2603_v43, %v2498_v58  ;;  %v2605_v32 = vpop.f32.mrb[86].mxu1  ;;  %v2528_v58 = vpop.permute.xlu1 %2527 }
 0x9a2   :  { %v2606_v42 = vadd.f32 %v2605_v32, %v2503_v39  ;;  %v2607_v52 = vpop.f32.mrb[87].mxu1  ;;  %v2640_v6 = vmax.f32 %v2602_v36, 0.0 }
 0x9a3   :  { %v2608_v3 = vadd.f32 %v2607_v52, %v2503_v39  ;;  %v2641_v13 = vmax.f32 %v2604_v46, 0.0  ;;  %v2533_v46 = vpop.permute.xlu0 %2532 }
 0x9a4   :  { %v2642_v12 = vmax.f32 %v2606_v42, 0.0 }
 0x9a5   :  { %v2643_v26 = vmax.f32 %v2608_v3, 0.0 }
 0x9a6   :  { %v2656_v23 = vpack.c.bf16 %v2642_v12, %v2640_v6 }
 0x9a7   :  { %v2657_v59 = vpack.c.bf16 %v2643_v26, %v2641_v13  ;;  %v2611_v11 = vpop.f32.mrb[88].mxu1 }
 0x9a8   :  { %v2612_v62 = vadd.f32 %v2611_v11, %v2508_v49  ;;  %v2613_v30 = vpop.f32.mrb[89].mxu1  ;;  %v3488_v11 = vld [vmem:[%s4971_s4 + $0x120] sm:$0xff]  }
 0x9a9   :  { %v2614_v33 = vadd.f32 %v2613_v30, %v2508_v49  ;;  %v2615_v60 = vpop.f32.mrb[90].mxu1  ;;  %2754 = vmatprep.subr.bf16.mxu1 %v2657_v59  ;;  %v3490_v30 = vld [vmem:[%s4971_s4 + $0x130] sm:$0xff]  }
 0x9aa   :  { %v2616_v44 = vadd.f32 %v2615_v60, %v2513_v15  ;;  %v2617_v35 = vpop.f32.mrb[91].mxu1  ;;  %2755 = vmatpush1.bf16.msra.mxu1 %v2656_v23  ;;  %v2644_v4 = vmax.f32 %v2612_v62, 0.0  ;;  %v3489_v62 = vld [vmem:[%s4971_s4 + $0x128] sm:$0xff]  }
 0x9ab   :  { %v2618_v34 = vadd.f32 %v2617_v35, %v2513_v15  ;;  %v2645_v48 = vmax.f32 %v2614_v33, 0.0  ;;  %v3491_v15 = vld [vmem:[%s4971_s4 + $0x138] sm:$0xff]   ;;  %v2685_v33 = vpop.permute.xlu1 %2684 }
 0x9ac   :  { %v2646_v31 = vmax.f32 %v2616_v44, 0.0 }
 0x9ad   :  { %v2647_v7 = vmax.f32 %v2618_v34, 0.0  ;;  %v2690_v34 = vpop.permute.xlu0 %2689 }
 0x9ae   :  { %v2658_v18 = vpack.c.bf16 %v2646_v31, %v2644_v4 }
 0x9af   :  { %v2659_v0 = vpack.c.bf16 %v2647_v7, %v2645_v48  ;;  %v2621_v50 = vpop.f32.mrb[92].mxu1 }
 0x9b0   :  { %v2622_v27 = vadd.f32 %v2621_v50, %v2518_v17  ;;  %v2623_v53 = vpop.f32.mrb[93].mxu1 }
 0x9b1   :  { %v2624_v8 = vadd.f32 %v2623_v53, %v2518_v17  ;;  %v2625_v57 = vpop.f32.mrb[94].mxu1  ;;  %2756 = vmatprep.subr.bf16.mxu1 %v2659_v0 }
 0x9b2   :  { %v2626_v5 = vadd.f32 %v2625_v57, %v2523_v38  ;;  %v2627_v10 = vpop.f32.mrb[95].mxu1  ;;  %2757 = vmatpush1.bf16.msra.mxu1 %v2658_v18  ;;  %v2648_v47 = vmax.f32 %v2622_v27, 0.0 }
 0x9b3   :  { %v2628_v41 = vadd.f32 %v2627_v10, %v2523_v38  ;;  %v2649_v56 = vmax.f32 %v2624_v8, 0.0  ;;  %v2695_v38 = vpop.permute.xlu1 %2694 }
 0x9b4   :  { %v2650_v45 = vmax.f32 %v2626_v5, 0.0 }
 0x9b5   :  { %v2651_v21 = vmax.f32 %v2628_v41, 0.0 }
 0x9b6   :  { %v2660_v63 = vpack.c.bf16 %v2650_v45, %v2648_v47  ;;  %v2700_v45 = vpop.permute.xlu0 %2699 }
 0x9b7   :  { %v2661_v14 = vpack.c.bf16 %v2651_v21, %v2649_v56  ;;  %v2631_v36 = vpop.f32.mrb[96].mxu1 }
 0x9b8   :  { %v2632_v43 = vadd.f32 %v2631_v36, %v2528_v58  ;;  %v2633_v39 = vpop.f32.mrb[97].mxu1 }
 0x9b9   :  { %v2634_v32 = vadd.f32 %v2633_v39, %v2528_v58  ;;  %v2635_v42 = vpop.f32.mrb[98].mxu1  ;;  %2758 = vmatprep.subr.bf16.mxu1 %v2661_v14 }
 0x9ba   :  { %v2636_v52 = vadd.f32 %v2635_v42, %v2533_v46  ;;  %v2637_v3 = vpop.f32.mrb[99].mxu1  ;;  %2759 = vmatpush1.bf16.msra.mxu1 %v2660_v63  ;;  %v2652_v12 = vmax.f32 %v2632_v43, 0.0 }
 0x9bb   :  { %v2638_v6 = vadd.f32 %v2637_v3, %v2533_v46  ;;  %v2653_v26 = vmax.f32 %v2634_v32, 0.0  ;;  %v2705_v46 = vpop.permute.xlu1 %2704 }
 0x9bc   :  { %v2654_v13 = vmax.f32 %v2636_v52, 0.0 }
 0x9bd   :  { %v2655_v23 = vmax.f32 %v2638_v6, 0.0 }
 0x9be   :  { %v2662_v49 = vpack.c.bf16 %v2654_v13, %v2652_v12  ;;  %v2710_v12 = vpop.permute.xlu0 %2709 }
 0x9bf   :  { %v2663_v59 = vpack.c.bf16 %v2655_v23, %v2653_v26 }
 0x9c1   :  { %2760 = vmatprep.subr.bf16.mxu1 %v2663_v59 }
 0x9c2   :  { %2761 = vmatpush1.bf16.msra.mxu1 %v2662_v49 }
 0x9c5   :  { %3202 = vmatmul.mubr.msk.bf16.vlgmr.msra.gmra.mrb[100].mxu1 %vm930_vm3, %v3488_v11 }
 0x9c6   :  { %2796 = vmatprep.mubr.bf16.mxu1 %v5037_v29 }
 0x9cd   :  { %3203 = vmatmul.mubr.msk.bf16.gmra.mrb[104].mxu1 %vm930_vm3, %v3489_v62 }
 0x9ce   :  { %2806 = vmatprep.mubr.bf16.mxu1 %v5037_v29 }
 0x9d5   :  { %3204 = vmatmul.mubr.msk.bf16.gmra.mrb[108].mxu1 %vm930_vm3, %v3490_v30 }
 0x9d6   :  { %2816 = vmatprep.mubr.bf16.mxu1 %v5037_v29 }
 0x9dd   :  { %3205 = vmatmul.mubr.msk.bf16.gmra.mrb[112].mxu1 %vm930_vm3, %v3491_v15 }
 0x9de   :  { %2921 = vmatprep.mubr.bf16.mxu1 %v5037_v29 }
 0xa98   :  { %v2788_v60 = vpop.f32.mrb[100].mxu1 }
 0xa99   :  { %v2789_v44 = vadd.f32 %v2788_v60, %v2685_v33  ;;  %v2790_v35 = vpop.f32.mrb[101].mxu1 }
 0xa9a   :  { %v2791_v4 = vadd.f32 %v2790_v35, %v2685_v33  ;;  %v2792_v31 = vpop.f32.mrb[102].mxu1  ;;  %v2715_v33 = vpop.permute.xlu1 %2714 }
 0xa9b   :  { %v2827_v48 = vadd.f32 %v4833_v55, %v2789_v44  ;;  %v2793_v7 = vadd.f32 %v2792_v31, %v2690_v34  ;;  %v2794_v18 = vpop.f32.mrb[103].mxu1  ;;  %v2720_v31 = vpop.permute.xlu0 %2719 }
 0xa9c   :  { %v2828_v17 = vadd.f32 %v4836_v37, %v2791_v4  ;;  %v2795_v0 = vadd.f32 %v2794_v18, %v2690_v34 }
 0xa9d   :  { %v2829_v50 = vadd.f32 %v4839_v28, %v2793_v7  ;;  %v2843_v53 = vmax.f32 %v2827_v48, 0.0 }
 0xa9e   :  { %v2830_v27 = vadd.f32 %v4841_v19, %v2795_v0  ;;  %v2844_v8 = vmax.f32 %v2828_v17, 0.0 }
 0xa9f   :  { %v2845_v29 = vmax.f32 %v2829_v50, 0.0 }
 0xaa0   :  { %v2846_v57 = vmax.f32 %v2830_v27, 0.0  ;;  %v2798_v5 = vpop.f32.mrb[104].mxu1 }
 0xaa1   :  { %v2859_v10 = vpack.c.bf16 %v2845_v29, %v2843_v53  ;;  %v2799_v41 = vadd.f32 %v2798_v5, %v2695_v38  ;;  %v2800_v47 = vpop.f32.mrb[105].mxu1 }
 0xaa2   :  { %v2801_v55 = vadd.f32 %v2800_v47, %v2695_v38  ;;  %v2802_v56 = vpop.f32.mrb[106].mxu1  ;;  %v2860_v21 = vpack.c.bf16 %v2846_v57, %v2844_v8  ;;  %v2879_v47 = vpop.permute.xlu0 %2878 }
 0xaa3   :  { %v2831_v37 = vadd.f32 %v4849_v61, %v2799_v41  ;;  %v2803_v63 = vadd.f32 %v2802_v56, %v2700_v45  ;;  %v2804_v58 = vpop.f32.mrb[107].mxu1 }
 0xaa4   :  { %v2832_v28 = vadd.f32 %v4852_v2, %v2801_v55  ;;  %v2805_v19 = vadd.f32 %v2804_v58, %v2700_v45  ;;  %2889 = vmatprep.subr.bf16.mxu1 %v2860_v21 }
 0xaa5   :  { %v2833_v14 = vadd.f32 %v4855_v20, %v2803_v63  ;;  %2890 = vmatpush1.bf16.msra.mxu1 %v2859_v10  ;;  %v2847_v43 = vmax.f32 %v2831_v37, 0.0 }
 0xaa6   :  { %v2834_v36 = vadd.f32 %v4857_v1, %v2805_v19  ;;  %v2848_v32 = vmax.f32 %v2832_v28, 0.0 }
 0xaa7   :  { %v2849_v39 = vmax.f32 %v2833_v14, 0.0 }
 0xaa8   :  { %v2850_v42 = vmax.f32 %v2834_v36, 0.0  ;;  %v2808_v52 = vpop.f32.mrb[108].mxu1 }
 0xaa9   :  { %v2861_v3 = vpack.c.bf16 %v2849_v39, %v2847_v43  ;;  %v2809_v6 = vadd.f32 %v2808_v52, %v2705_v46  ;;  %v2810_v61 = vpop.f32.mrb[109].mxu1 }
 0xaaa   :  { %v2811_v13 = vadd.f32 %v2810_v61, %v2705_v46  ;;  %v2812_v26 = vpop.f32.mrb[110].mxu1  ;;  %v2862_v2 = vpack.c.bf16 %v2850_v42, %v2848_v32 }
 0xaab   :  { %v2835_v23 = vadd.f32 %v4865_v9, %v2809_v6  ;;  %v2813_v49 = vadd.f32 %v2812_v26, %v2710_v12  ;;  %v2814_v20 = vpop.f32.mrb[111].mxu1 }
 0xaac   :  { %v2836_v59 = vadd.f32 %v4868_v24, %v2811_v13  ;;  %v2815_v1 = vadd.f32 %v2814_v20, %v2710_v12  ;;  %2891 = vmatprep.subr.bf16.mxu1 %v2862_v2 }
 0xaad   :  { %v2837_v11 = vadd.f32 %v4871_v25, %v2813_v49  ;;  %2892 = vmatpush1.bf16.msra.mxu1 %v2861_v3  ;;  %v2851_v30 = vmax.f32 %v2835_v23, 0.0 }
 0xaae   :  { %v2838_v62 = vadd.f32 %v4873_v51, %v2815_v1  ;;  %v2852_v60 = vmax.f32 %v2836_v59, 0.0 }
 0xaaf   :  { %v2853_v15 = vmax.f32 %v2837_v11, 0.0 }
 0xab0   :  { %v2854_v44 = vmax.f32 %v2838_v62, 0.0  ;;  %v2818_v35 = vpop.f32.mrb[112].mxu1 }
 0xab1   :  { %v2863_v34 = vpack.c.bf16 %v2853_v15, %v2851_v30  ;;  %v2819_v4 = vadd.f32 %v2818_v35, %v2715_v33  ;;  %v2820_v9 = vpop.f32.mrb[113].mxu1 }
 0xab2   :  { %v2821_v48 = vadd.f32 %v2820_v9, %v2715_v33  ;;  %v2822_v7 = vpop.f32.mrb[114].mxu1  ;;  %v2864_v24 = vpack.c.bf16 %v2854_v44, %v2852_v60 }
 0xab3   :  { %v2839_v18 = vadd.f32 %v4881_v16, %v2819_v4  ;;  %v2823_v17 = vadd.f32 %v2822_v7, %v2720_v31  ;;  %v2824_v25 = vpop.f32.mrb[115].mxu1  ;;  %v3492_v16 = vld [vmem:[%s4974_s6] sm:$0x7f]  }
 0xab4   :  { %v2840_v0 = vadd.f32 %v4884_v40, %v2821_v48  ;;  %v2825_v51 = vadd.f32 %v2824_v25, %v2720_v31  ;;  %2893 = vmatprep.subr.bf16.mxu1 %v2864_v24  ;;  %v2874_v40 = vpop.permute.xlu1 %2873 }
 0xab5   :  { %v2841_v50 = vadd.f32 %v4887_v54, %v2823_v17  ;;  %2894 = vmatpush1.bf16.msra.mxu1 %v2863_v34  ;;  %v2855_v53 = vmax.f32 %v2839_v18, 0.0 }
 0xab6   :  { %v2842_v27 = vadd.f32 %v4889_v22, %v2825_v51  ;;  %v2856_v38 = vmax.f32 %v2840_v0, 0.0 }
 0xab7   :  { %v2857_v29 = vmax.f32 %v2841_v50, 0.0 }
 0xab8   :  { %v2858_v8 = vmax.f32 %v2842_v27, 0.0 }
 0xab9   :  { %v2865_v57 = vpack.c.bf16 %v2857_v29, %v2855_v53 }
 0xaba   :  { %v2866_v5 = vpack.c.bf16 %v2858_v8, %v2856_v38 }
 0xabc   :  { %2895 = vmatprep.subr.bf16.mxu1 %v2866_v5 }
 0xabd   :  { %2896 = vmatpush1.bf16.msra.mxu1 %v2865_v57 }
 0xac0   :  { %3207 = vmatmul.mubr.msk.bf16.vlgmr.msra.gmra.mrb[116].mxu1 %vm930_vm3, %v3492_v16 }
 0xb93   :  { %v2923_v10 = vpop.f32.mrb[116].mxu1 }
 0xb94   :  { %v2924_v54 = vadd.f32 %v2923_v10, %v2874_v40  ;;  %v2925_v41 = vpop.f32.mrb[117].mxu1 }
 0xb95   :  { %v2926_v22 = vadd.f32 %v2925_v41, %v2874_v40  ;;  %v2927_v45 = vpop.f32.mrb[118].mxu1 }
 0xb96   :  { %2932 = vst [vmem:[%s4975_s8] sm:$0xff] %v2924_v54  ;;  %v2928_v55 = vadd.f32 %v2927_v45, %v2879_v47  ;;  %v2929_v56 = vpop.f32.mrb[119].mxu1 }
 0xb97   :  { %2933 = vst [vmem:[%s4975_s8 + $0x8] sm:$0xff] %v2926_v22  ;;  %v2930_v21 = vadd.f32 %v2929_v56, %v2879_v47 }
 0xb98   :  { %2934 = vst [vmem:[%s4975_s8 + $0x10] sm:$0x1f] %v2928_v55 }
 0xb99   :  { %2935 = vst [vmem:[%s4975_s8 + $0x18] sm:$0x1f] %v2930_v21 }

</bundles_post_ra>
